<compile_context>
chip_gen: v7x
topology: tpu7x:2x2x1
jax: 0.10.0
libtpu: 0.0.40
codegen_flags: <defaults>
</compile_context>

<pallas_src>
import math
import functools

import jax
import jax.numpy as jnp
from jax.experimental import pallas as pl
from jax.experimental.pallas import tpu as pltpu


# ---------------------------------------------------------------------------
# Stage 1: fused Q/K/V input projections (once per (batch, seq-tile)).
# ---------------------------------------------------------------------------
def qkv_proj_kernel(q_ref, k_ref, v_ref,
                    wq_ref, bq_ref, wk_ref, bk_ref, wv_ref, bv_ref,
                    qp_ref, kp_ref, vp_ref, *, q_scale: float):
    # Full-width 2-D matmuls: (ts, D) @ (D, D), f32 accumulation, bf16 outputs.
    qp = jnp.dot(q_ref[0], wq_ref[...], preferred_element_type=jnp.float32) + bq_ref[...]
    qp_ref[0] = (qp * q_scale).astype(qp_ref.dtype)   # fold log2(e)/sqrt(d_k) into Q
    kp = jnp.dot(k_ref[0], wk_ref[...], preferred_element_type=jnp.float32) + bk_ref[...]
    kp_ref[0] = kp.astype(kp_ref.dtype)
    vp = jnp.dot(v_ref[0], wv_ref[...], preferred_element_type=jnp.float32) + bv_ref[...]
    vp_ref[0] = vp.astype(vp_ref.dtype)


# ---------------------------------------------------------------------------
# Stage 2: flash attention over pre-projected Q/K/V + fused output projection.
# ---------------------------------------------------------------------------
def flash_attn_kernel(q_ref, k_ref, v_ref, wo_ref, bo_ref, o_ref,
                      m_sc, l_sc, acc_sc, *, num_heads: int, d_k: int):
    ki = pl.program_id(2)

    # ---- per-(batch, q-tile) init: reset online-softmax state.
    @pl.when(ki == 0)
    def _init():
        m_sc[...] = jnp.full(m_sc.shape, -jnp.inf, dtype=jnp.float32)
        l_sc[...] = jnp.zeros(l_sc.shape, dtype=jnp.float32)
        acc_sc[...] = jnp.zeros(acc_sc.shape, dtype=jnp.float32)

    q = q_ref[0]  # (tq, D) bf16, already scaled by log2(e)/sqrt(d_k)
    k = k_ref[0]  # (tk, D) bf16
    v = v_ref[0]  # (tk, D) bf16

    # Unrolled head loop: only one head's (tq, tk) f32 score tile live at a time.
    for h in range(num_heads):
        sl = slice(h * d_k, (h + 1) * d_k)      # lane-aligned head slice (head-major D)
        # Scores in log2 domain (scale folded into Q): (tq, tk) f32.
        s = jnp.einsum('qd,kd->qk', q[:, sl], k[:, sl],
                       preferred_element_type=jnp.float32)
        # TODO(synk): mask is None in this forward config; masked_fill(-inf) path not implemented.
        m_prev = m_sc[:, h:h + 1]
        m_new = jnp.maximum(m_prev, jnp.max(s, axis=-1, keepdims=True))
        alpha = jnp.exp2(m_prev - m_new)
        p = jnp.exp2(s - m_new)
        l_sc[:, h:h + 1] = alpha * l_sc[:, h:h + 1] + jnp.sum(p, axis=-1, keepdims=True)
        acc_sc[:, sl] = alpha * acc_sc[:, sl] + jnp.dot(
            p.astype(jnp.bfloat16), v[:, sl], preferred_element_type=jnp.float32)
        m_sc[:, h:h + 1] = m_new
    # TODO(synk): nn.Dropout on attn is identity in eval mode; not applied here.

    # ---- finalize: normalize per head, then one full-width output projection.
    @pl.when(ki == pl.num_programs(2) - 1)
    def _finalize():
        inv_l = pl.reciprocal(l_sc[...], approx=True)            # (tq, H)
        for h in range(num_heads):
            sl = slice(h * d_k, (h + 1) * d_k)
            acc_sc[:, sl] = acc_sc[:, sl] * inv_l[:, h:h + 1]
        ctx = acc_sc[...].astype(jnp.bfloat16)                    # (tq, D), head-major == torch concat
        out = jnp.dot(ctx, wo_ref[...], preferred_element_type=jnp.float32) + bo_ref[...]
        o_ref[0] = out.astype(o_ref.dtype)


def multi_head_attention(q, k, v, params, *, num_heads: int,
                         block_q: int = 128, block_k: int = 256,
                         proj_block: int = 256, vmem_limit_bytes=None):
    """q, k, v: [B, S, D] float32. params: [d_in, d_out] weights, [1, d_out] biases."""
    B, S, D = q.shape
    assert D % num_heads == 0, "d_model must be divisible by num_heads"
    d_k = D // num_heads
    block_q = min(block_q, S)
    block_k = min(block_k, S)
    proj_block = min(proj_block, S)
    assert S % block_q == 0 and S % block_k == 0 and S % proj_block == 0, \
        "seq_len must divide the tile sizes"

    # bf16 matmul inputs (f32 accumulation inside the kernels).
    qb = q.astype(jnp.bfloat16)
    kb = k.astype(jnp.bfloat16)
    vb = v.astype(jnp.bfloat16)
    wq = params["wq"].astype(jnp.bfloat16)
    wk = params["wk"].astype(jnp.bfloat16)
    wv = params["wv"].astype(jnp.bfloat16)
    wo = params["wo"].astype(jnp.bfloat16)
    bq, bk, bv, bo = params["bq"], params["bk"], params["bv"], params["bo"]

    # exp2-domain softmax: fold log2(e) into the 1/sqrt(d_k) Q scale.
    q_scale = (1.0 / math.sqrt(d_k)) * math.log2(math.e)

    extra_cparams = {}
    if vmem_limit_bytes is not None:   # raise above the 32 MiB scoped default for big tiles
        extra_cparams["vmem_limit_bytes"] = vmem_limit_bytes

    # ---- Stage 1: Q/K/V projections, hoisted out of the kv loop. ----
    x_spec = pl.BlockSpec((1, proj_block, D), lambda b, si: (b, si, 0))
    w_spec = pl.BlockSpec((D, D), lambda b, si: (0, 0))
    b_spec = pl.BlockSpec((1, D), lambda b, si: (0, 0))
    qp, kp, vp = pl.pallas_call(
        functools.partial(qkv_proj_kernel, q_scale=q_scale),
        out_shape=tuple(jax.ShapeDtypeStruct((B, S, D), jnp.bfloat16) for _ in range(3)),
        grid_spec=pltpu.PrefetchScalarGridSpec(
            num_scalar_prefetch=0,
            grid=(B, S // proj_block),
            in_specs=[x_spec, x_spec, x_spec,
                      w_spec, b_spec, w_spec, b_spec, w_spec, b_spec],
            out_specs=[x_spec, x_spec, x_spec],
        ),
        compiler_params=pltpu.CompilerParams(
            dimension_semantics=("parallel", "parallel"), **extra_cparams),
    )(qb, kb, vb, wq, bq, wk, bk, wv, bv)

    # ---- Stage 2: flash attention + fused output projection. ----
    q_spec = pl.BlockSpec((1, block_q, D), lambda b, qi, ki: (b, qi, 0))
    kv_spec = pl.BlockSpec((1, block_k, D), lambda b, qi, ki: (b, ki, 0))
    wo_spec = pl.BlockSpec((D, D), lambda b, qi, ki: (0, 0))
    bo_spec = pl.BlockSpec((1, D), lambda b, qi, ki: (0, 0))
    out_spec = pl.BlockSpec((1, block_q, D), lambda b, qi, ki: (b, qi, 0))

    return pl.pallas_call(
        functools.partial(flash_attn_kernel, num_heads=num_heads, d_k=d_k),
        out_shape=jax.ShapeDtypeStruct((B, S, D), q.dtype),
        grid_spec=pltpu.PrefetchScalarGridSpec(
            num_scalar_prefetch=0,
            grid=(B, S // block_q, S // block_k),
            in_specs=[q_spec, kv_spec, kv_spec, wo_spec, bo_spec],
            out_specs=out_spec,
            scratch_shapes=[
                pltpu.VMEM((block_q, num_heads), jnp.float32),  # running max m (log2 domain)
                pltpu.VMEM((block_q, num_heads), jnp.float32),  # running denom l
                pltpu.VMEM((block_q, D), jnp.float32),          # output accumulator (head-major)
            ],
        ),
        compiler_params=pltpu.CompilerParams(
            dimension_semantics=("parallel", "parallel", "arbitrary"), **extra_cparams),
    )(qp, kp, vp, wo, bo)


def reference_mha(q, k, v, params, *, num_heads: int):
    """Pure-JAX f32 reference mirroring the PyTorch forward (eval mode, mask=None)."""
    B, S, D = q.shape
    d_k = D // num_heads

    def lin(x, w, b):
        return x @ w + b  # w already [d_in, d_out]

    Q = lin(q, params["wq"], params["bq"]).reshape(B, S, num_heads, d_k).transpose(0, 2, 1, 3)
    K = lin(k, params["wk"], params["bk"]).reshape(B, S, num_heads, d_k).transpose(0, 2, 1, 3)
    V = lin(v, params["wv"], params["bv"]).reshape(B, S, num_heads, d_k).transpose(0, 2, 1, 3)
    scores = jnp.einsum("bhqd,bhkd->bhqk", Q, K) / math.sqrt(d_k)
    attn = jax.nn.softmax(scores, axis=-1)
    out = jnp.einsum("bhqk,bhkd->bhqd", attn, V)
    out = out.transpose(0, 2, 1, 3).reshape(B, S, D)
    return lin(out, params["wo"], params["bo"])


if __name__ == "__main__":
    # Lane-dense demo shapes: d_model multiple of 128, d_k = 128 per head.
    B, S, D, H = 2, 256, 256, 2          # batch, seq_len, d_model, num_heads

    key = jax.random.PRNGKey(0)
    keys = jax.random.split(key, 12)

    # Deterministic "checkpoint": weights stored as [d_in, d_out] (pre-transposed
    # relative to torch.nn.Linear), biases as [1, d_out].
    def init_w(kk):
        return jax.random.normal(kk, (D, D), dtype=jnp.float32) / math.sqrt(D)

    def init_b(kk):
        return jax.random.normal(kk, (1, D), dtype=jnp.float32) * 0.01

    params = {
        "wq": init_w(keys[0]), "bq": init_b(keys[1]),
        "wk": init_w(keys[2]), "bk": init_b(keys[3]),
        "wv": init_w(keys[4]), "bv": init_b(keys[5]),
        "wo": init_w(keys[6]), "bo": init_b(keys[7]),
    }

    q = jax.random.normal(keys[8],  (B, S, D), dtype=jnp.float32)
    k = jax.random.normal(keys[9],  (B, S, D), dtype=jnp.float32)
    v = jax.random.normal(keys[10], (B, S, D), dtype=jnp.float32)

    out = multi_head_attention(q, k, v, params, num_heads=H)
    out = jax.block_until_ready(out)

    ref = reference_mha(q, k, v, params, num_heads=H)
    assert out.shape == (B, S, D)
    # Kernel uses bf16 matmul inputs with f32 accumulation -> compare against the
    # pure-f32 reference at a bf16-appropriate tolerance.
    assert jnp.allclose(out, ref, atol=5e-2, rtol=5e-2), "Pallas kernel mismatch vs reference"

    print("KERNEL_OK")
</pallas_src>

<mosaic_0001>
module attributes {stable_mosaic.version = 11 : i64} {
  func.func @qkv_proj_kernel(%arg0: i32, %arg1: i32, %arg2: memref<1x256x256xbf16, #tpu.memory_space<vmem>>, %arg3: memref<1x256x256xbf16, #tpu.memory_space<vmem>>, %arg4: memref<1x256x256xbf16, #tpu.memory_space<vmem>>, %arg5: memref<256x256xbf16, #tpu.memory_space<vmem>>, %arg6: memref<1x256xf32, #tpu.memory_space<vmem>>, %arg7: memref<256x256xbf16, #tpu.memory_space<vmem>>, %arg8: memref<1x256xf32, #tpu.memory_space<vmem>>, %arg9: memref<256x256xbf16, #tpu.memory_space<vmem>>, %arg10: memref<1x256xf32, #tpu.memory_space<vmem>>, %arg11: memref<1x256x256xbf16, #tpu.memory_space<vmem>>, %arg12: memref<1x256x256xbf16, #tpu.memory_space<vmem>>, %arg13: memref<1x256x256xbf16, #tpu.memory_space<vmem>>) attributes {dimension_semantics = [#tpu.dimension_semantics<parallel>, #tpu.dimension_semantics<parallel>], iteration_bounds = array<i64: 2, 1>, scalar_prefetch = 0 : i64, scratch_operands = 0 : i64, tpu.core_type = #tpu.core_type<tc>, window_params = [{transform_indices = @transform_0, window_bounds = array<i64: 1, 256, 256>}, {transform_indices = @transform_1, window_bounds = array<i64: 1, 256, 256>}, {transform_indices = @transform_2, window_bounds = array<i64: 1, 256, 256>}, {pipeline_mode = #tpu.pipeline_mode<synchronous>, transform_indices = @transform_3, window_bounds = array<i64: 256, 256>}, {pipeline_mode = #tpu.pipeline_mode<synchronous>, transform_indices = @transform_4, window_bounds = array<i64: 1, 256>}, {pipeline_mode = #tpu.pipeline_mode<synchronous>, transform_indices = @transform_5, window_bounds = array<i64: 256, 256>}, {pipeline_mode = #tpu.pipeline_mode<synchronous>, transform_indices = @transform_6, window_bounds = array<i64: 1, 256>}, {pipeline_mode = #tpu.pipeline_mode<synchronous>, transform_indices = @transform_7, window_bounds = array<i64: 256, 256>}, {pipeline_mode = #tpu.pipeline_mode<synchronous>, transform_indices = @transform_8, window_bounds = array<i64: 1, 256>}, {transform_indices = @transform_9, window_bounds = array<i64: 1, 256, 256>}, {transform_indices = @transform_10, window_bounds = array<i64: 1, 256, 256>}, {transform_indices = @transform_11, window_bounds = array<i64: 1, 256, 256>}]} {
    %c0 = arith.constant 0 : index
    %c0_0 = arith.constant 0 : index
    %c0_1 = arith.constant 0 : index
    %0 = vector.load %arg2[%c0, %c0_0, %c0_1] : memref<1x256x256xbf16, #tpu.memory_space<vmem>>, vector<1x256x256xbf16>
    %1 = vector.shape_cast %0 : vector<1x256x256xbf16> to vector<256x256xbf16>
    %c0_2 = arith.constant 0 : index
    %c0_3 = arith.constant 0 : index
    %2 = vector.load %arg5[%c0_2, %c0_3] : memref<256x256xbf16, #tpu.memory_space<vmem>>, vector<256x256xbf16>
    %cst = arith.constant dense<0.000000e+00> : vector<256x256xf32>
    %3 = tpu.matmul %1, %2, %cst {dimension_numbers = #tpu.dot_dimension_numbers<[1], [0], [0], [1], [0, 0, 1, 1], [], []>} : vector<256x256xbf16>, vector<256x256xbf16>, vector<256x256xf32> -> vector<256x256xf32>
    %c0_4 = arith.constant 0 : index
    %c0_5 = arith.constant 0 : index
    %4 = vector.load %arg6[%c0_4, %c0_5] : memref<1x256xf32, #tpu.memory_space<vmem>>, vector<1x256xf32>
    %5 = vector.broadcast %4 : vector<1x256xf32> to vector<256x256xf32>
    %6 = arith.addf %3, %5 : vector<256x256xf32>
    %cst_6 = arith.constant 0.127517432 : f32
    %7 = vector.broadcast %cst_6 : f32 to vector<256x256xf32>
    %8 = arith.mulf %6, %7 : vector<256x256xf32>
    %9 = arith.truncf %8 : vector<256x256xf32> to vector<256x256xbf16>
    %c0_7 = arith.constant 0 : index
    %c0_8 = arith.constant 0 : index
    %c0_9 = arith.constant 0 : index
    %10 = vector.load %arg11[%c0_7, %c0_8, %c0_9] : memref<1x256x256xbf16, #tpu.memory_space<vmem>>, vector<1x256x256xbf16>
    %11 = vector.shape_cast %10 : vector<1x256x256xbf16> to vector<256x256xbf16>
    %12 = vector.shape_cast %9 : vector<256x256xbf16> to vector<1x256x256xbf16>
    tpu.vector_store %arg11[%c0_7, %c0_8, %c0_9], %12 {strides = array<i32>} : memref<1x256x256xbf16, #tpu.memory_space<vmem>>, vector<1x256x256xbf16>,
    %c0_10 = arith.constant 0 : index
    %c0_11 = arith.constant 0 : index
    %c0_12 = arith.constant 0 : index
    %13 = vector.load %arg3[%c0_10, %c0_11, %c0_12] : memref<1x256x256xbf16, #tpu.memory_space<vmem>>, vector<1x256x256xbf16>
    %14 = vector.shape_cast %13 : vector<1x256x256xbf16> to vector<256x256xbf16>
    %c0_13 = arith.constant 0 : index
    %c0_14 = arith.constant 0 : index
    %15 = vector.load %arg7[%c0_13, %c0_14] : memref<256x256xbf16, #tpu.memory_space<vmem>>, vector<256x256xbf16>
    %cst_15 = arith.constant dense<0.000000e+00> : vector<256x256xf32>
    %16 = tpu.matmul %14, %15, %cst_15 {dimension_numbers = #tpu.dot_dimension_numbers<[1], [0], [0], [1], [0, 0, 1, 1], [], []>} : vector<256x256xbf16>, vector<256x256xbf16>, vector<256x256xf32> -> vector<256x256xf32>
    %c0_16 = arith.constant 0 : index
    %c0_17 = arith.constant 0 : index
    %17 = vector.load %arg8[%c0_16, %c0_17] : memref<1x256xf32, #tpu.memory_space<vmem>>, vector<1x256xf32>
    %18 = vector.broadcast %17 : vector<1x256xf32> to vector<256x256xf32>
    %19 = arith.addf %16, %18 : vector<256x256xf32>
    %20 = arith.truncf %19 : vector<256x256xf32> to vector<256x256xbf16>
    %c0_18 = arith.constant 0 : index
    %c0_19 = arith.constant 0 : index
    %c0_20 = arith.constant 0 : index
    %21 = vector.load %arg12[%c0_18, %c0_19, %c0_20] : memref<1x256x256xbf16, #tpu.memory_space<vmem>>, vector<1x256x256xbf16>
    %22 = vector.shape_cast %21 : vector<1x256x256xbf16> to vector<256x256xbf16>
    %23 = vector.shape_cast %20 : vector<256x256xbf16> to vector<1x256x256xbf16>
    tpu.vector_store %arg12[%c0_18, %c0_19, %c0_20], %23 {strides = array<i32>} : memref<1x256x256xbf16, #tpu.memory_space<vmem>>, vector<1x256x256xbf16>,
    %c0_21 = arith.constant 0 : index
    %c0_22 = arith.constant 0 : index
    %c0_23 = arith.constant 0 : index
    %24 = vector.load %arg4[%c0_21, %c0_22, %c0_23] : memref<1x256x256xbf16, #tpu.memory_space<vmem>>, vector<1x256x256xbf16>
    %25 = vector.shape_cast %24 : vector<1x256x256xbf16> to vector<256x256xbf16>
    %c0_24 = arith.constant 0 : index
    %c0_25 = arith.constant 0 : index
    %26 = vector.load %arg9[%c0_24, %c0_25] : memref<256x256xbf16, #tpu.memory_space<vmem>>, vector<256x256xbf16>
    %cst_26 = arith.constant dense<0.000000e+00> : vector<256x256xf32>
    %27 = tpu.matmul %25, %26, %cst_26 {dimension_numbers = #tpu.dot_dimension_numbers<[1], [0], [0], [1], [0, 0, 1, 1], [], []>} : vector<256x256xbf16>, vector<256x256xbf16>, vector<256x256xf32> -> vector<256x256xf32>
    %c0_27 = arith.constant 0 : index
    %c0_28 = arith.constant 0 : index
    %28 = vector.load %arg10[%c0_27, %c0_28] : memref<1x256xf32, #tpu.memory_space<vmem>>, vector<1x256xf32>
    %29 = vector.broadcast %28 : vector<1x256xf32> to vector<256x256xf32>
    %30 = arith.addf %27, %29 : vector<256x256xf32>
    %31 = arith.truncf %30 : vector<256x256xf32> to vector<256x256xbf16>
    %c0_29 = arith.constant 0 : index
    %c0_30 = arith.constant 0 : index
    %c0_31 = arith.constant 0 : index
    %32 = vector.load %arg13[%c0_29, %c0_30, %c0_31] : memref<1x256x256xbf16, #tpu.memory_space<vmem>>, vector<1x256x256xbf16>
    %33 = vector.shape_cast %32 : vector<1x256x256xbf16> to vector<256x256xbf16>
    %34 = vector.shape_cast %31 : vector<256x256xbf16> to vector<1x256x256xbf16>
    tpu.vector_store %arg13[%c0_29, %c0_30, %c0_31], %34 {strides = array<i32>} : memref<1x256x256xbf16, #tpu.memory_space<vmem>>, vector<1x256x256xbf16>,
    return
  }
  func.func @transform_0(%arg0: i32, %arg1: i32) -> (i32, i32, i32) {
    %c0_i32 = arith.constant 0 : i32
    %c0_i32_0 = arith.constant 0 : i32
    return %arg0, %arg1, %c0_i32 : i32, i32, i32
  }
  func.func @transform_1(%arg0: i32, %arg1: i32) -> (i32, i32, i32) {
    %c0_i32 = arith.constant 0 : i32
    %c0_i32_0 = arith.constant 0 : i32
    return %arg0, %arg1, %c0_i32 : i32, i32, i32
  }
  func.func @transform_2(%arg0: i32, %arg1: i32) -> (i32, i32, i32) {
    %c0_i32 = arith.constant 0 : i32
    %c0_i32_0 = arith.constant 0 : i32
    return %arg0, %arg1, %c0_i32 : i32, i32, i32
  }
  func.func @transform_3(%arg0: i32, %arg1: i32) -> (i32, i32) {
    %c0_i32 = arith.constant 0 : i32
    %c0_i32_0 = arith.constant 0 : i32
    %c0_i32_1 = arith.constant 0 : i32
    return %c0_i32, %c0_i32_0 : i32, i32
  }
  func.func @transform_4(%arg0: i32, %arg1: i32) -> (i32, i32) {
    %c0_i32 = arith.constant 0 : i32
    %c0_i32_0 = arith.constant 0 : i32
    %c0_i32_1 = arith.constant 0 : i32
    return %c0_i32, %c0_i32_0 : i32, i32
  }
  func.func @transform_5(%arg0: i32, %arg1: i32) -> (i32, i32) {
    %c0_i32 = arith.constant 0 : i32
    %c0_i32_0 = arith.constant 0 : i32
    %c0_i32_1 = arith.constant 0 : i32
    return %c0_i32, %c0_i32_0 : i32, i32
  }
  func.func @transform_6(%arg0: i32, %arg1: i32) -> (i32, i32) {
    %c0_i32 = arith.constant 0 : i32
    %c0_i32_0 = arith.constant 0 : i32
    %c0_i32_1 = arith.constant 0 : i32
    return %c0_i32, %c0_i32_0 : i32, i32
  }
  func.func @transform_7(%arg0: i32, %arg1: i32) -> (i32, i32) {
    %c0_i32 = arith.constant 0 : i32
    %c0_i32_0 = arith.constant 0 : i32
    %c0_i32_1 = arith.constant 0 : i32
    return %c0_i32, %c0_i32_0 : i32, i32
  }
  func.func @transform_8(%arg0: i32, %arg1: i32) -> (i32, i32) {
    %c0_i32 = arith.constant 0 : i32
    %c0_i32_0 = arith.constant 0 : i32
    %c0_i32_1 = arith.constant 0 : i32
    return %c0_i32, %c0_i32_0 : i32, i32
  }
  func.func @transform_9(%arg0: i32, %arg1: i32) -> (i32, i32, i32) {
    %c0_i32 = arith.constant 0 : i32
    %c0_i32_0 = arith.constant 0 : i32
    return %arg0, %arg1, %c0_i32 : i32, i32, i32
  }
  func.func @transform_10(%arg0: i32, %arg1: i32) -> (i32, i32, i32) {
    %c0_i32 = arith.constant 0 : i32
    %c0_i32_0 = arith.constant 0 : i32
    return %arg0, %arg1, %c0_i32 : i32, i32, i32
  }
  func.func @transform_11(%arg0: i32, %arg1: i32) -> (i32, i32, i32) {
    %c0_i32 = arith.constant 0 : i32
    %c0_i32_0 = arith.constant 0 : i32
    return %arg0, %arg1, %c0_i32 : i32, i32, i32
  }
}

</mosaic_0001>

<bundles_post_ra>
// kernel: tpu_custom_call.1
= control target key start
LH: loop header
LB: loop body
LE: loop exit
PB: predicated region body
PF: predicated region fallthrough
CT: control target
= control target key end

     0   :  { %s5549_s0 = inlined_call_operand.hbm [shape: bf16[2,256,256], index: 0, kind: input, shape index: {}]   ;;  %s5550_s1 = inlined_call_operand.hbm [shape: bf16[2,256,256], index: 1, kind: input, shape index: {}]   ;;  %s5551_s2 = inlined_call_operand.hbm [shape: bf16[2,256,256], index: 2, kind: input, shape index: {}]   ;;  %s5552_s3 = inlined_call_operand.hbm [shape: bf16[256,256], index: 3, kind: input, shape index: {}]   ;;  %s5553_s4 = inlined_call_operand.vmem [shape: f32[1,256], index: 4, kind: input, shape index: {}]   ;;  %s5554_s5 = inlined_call_operand.hbm [shape: bf16[256,256], index: 5, kind: input, shape index: {}]   ;;  %s5555_s6 = inlined_call_operand.vmem [shape: f32[1,256], index: 6, kind: input, shape index: {}]   ;;  %s5556_s7 = inlined_call_operand.hbm [shape: bf16[256,256], index: 7, kind: input, shape index: {}]   ;;  %s5557_s8 = inlined_call_operand.vmem [shape: f32[1,256], index: 8, kind: input, shape index: {}]   ;;  %s5558_s9 = inlined_call_operand.hbm [shape: bf16[2,256,256], index: 9, kind: output, shape index: {0}]   ;;  %s5559_s10 = inlined_call_operand.hbm [shape: bf16[2,256,256], index: 10, kind: output, shape index: {1}]   ;;  %s5560_s11 = inlined_call_operand.hbm [shape: bf16[2,256,256], index: 11, kind: output, shape index: {2}]  }
   0x1   :  { %5590 = sst [smem:[#allocation31_spill]] %s5550_s1 }
   0x2   :  { %5591 = sst [smem:[#allocation32_spill]] %s5552_s3 }
   0x3   :  { %5592 = sst [smem:[#allocation33_spill]] %s5555_s6 }
   0x4   :  { %5593 = sst [smem:[#allocation34_spill]] %s5557_s8 }
   0x5   :  { %5594 = sst [smem:[#allocation35_spill]] %s5558_s9 }
   0x6   :  { %5595 = sst [smem:[#allocation36_spill]] %s5559_s10 }
   0x7   :  { %5596 = sst [smem:[#allocation37_spill]] %s5560_s11 }
   0x8   :  { %17 = vsyncpa [#allocation3], 0 }
   0x9   :  { %19 = vsyncpa [#allocation3 + $0x1], 0 }
   0xa   :  { %20 = vsyncpa [#allocation6], 0 }
   0xb   :  { %22 = vsyncpa [#allocation6 + $0x1], 0 }
   0xc   :  { %23 = vsyncpa [#allocation9], 0 }
   0xd   :  { %24 = vsyncpa [#allocation12], 0 }
   0xe   :  { %25 = vsyncpa [#allocation4], 0 }
   0xf   :  { %27 = vsyncpa [#allocation4 + $0x1], 0 }
  0x10   :  { %28 = vsyncpa [#allocation15], 0 }
  0x11   :  { %30 = vsyncpa [#allocation15 + $0x1], 0  ;;  %s4650_s17 = smov 0   ;;  %s4652_s18 = smov 0  }
  0x12   :  { %s4654_s19 = smov 0   ;;  %s4656_s20 = smov 0  }
  0x13   :  { %s4658_s21 = smov 0   ;;  %s4660_s22 = smov 0  }
  0x14 LB: > { %5597 = sst [smem:[#allocation23_spill]] %s4555_s17  ;;  %s4681_s23 = sadd.s32 4294967295, %s4575_s22   ;;  %s4575_s22 = sphi %s4660_s22, %s36_s22   ;;  %s4571_s21 = sphi %s4658_s21, %s5647_s21   ;;  %s4567_s20 = sphi %s4656_s20, %s5646_s20   ;;  %s4563_s19 = sphi %s4654_s19, %s5650_s19   ;;  %s4559_s18 = sphi %s4652_s18, %s5649_s18   ;;  %s4555_s17 = sphi %s4650_s17, %s5648_s17  }
  0x15   : > { %5598 = sst [smem:[#allocation24_spill]] %s4567_s20  ;;  %s5561_s24 = sadd.s32 4294967294, %s4575_s22  }
  0x16   : > { %5599 = sst [smem:[#allocation25_spill]] %s4571_s21  ;;  %p64_p0 = scmp.ne.s32.totalorder %s4563_s19, %s4559_s18 }
  0x17   : > { %5600 = sst [smem:[#allocation26_spill]] %s4575_s22  ;;  %p65_p1 = scmp.eq.s32.totalorder %s4575_s22, 0 }
  0x18   : > { %p70_p2 = scmp.ne.s32.totalorder %s4559_s18, %s4555_s17  ;;  %p5568_p3 = scmp.eq.s32.totalorder %s4681_s23, 0 }
  0x19   : > { %p4690_p4 = por %p65_p1, %p64_p0  ;;  %p278_p5 = scmp.eq.s32.totalorder %s4681_s23, 1 }
  0x1a   : > { %p4697_p6 = por %p5568_p3, %p70_p2  ;;  %p284_p7 = scmp.eq.s32.totalorder %s5561_s24, 1 }
  0x1b   : > { %p4703_p8 = por %p278_p5, %p64_p0  ;;  %p3385_p9 = scmp.ge.s32.totalorder %s4575_s22, 1 }
  0x1c   : > { %s5602_s26 = scalar_select %p4697_p6, 1, 0 }
  0x1d   : > { %s5603_s27 = scalar_select %p4703_p8, 1, 0 }
  0x1e   : > { %p4708_p10 = por %p284_p7, %p70_p2  ;;  %p347_p11 = scmp.lt.s32.totalorder %s4575_s22, 3 }
  0x1f   : > { %5604 = sst [smem:[#allocation27_spill]] %s5603_s27  ;;  %s4577_s30 = smov [#allocation8]  }
  0x20   : > { %s5605_s28 = scalar_select %p4708_p10, 1, 0 }
  0x21   : > { %p4713_p12 = pnand %p3385_p9, %p347_p11  ;;  %s359_s12 = sshll.u32 %s4577_s30, 4  ;;  %s4717_s12 = int_to_ptr.vmem [resolvable:$true] %s359_s12 }
  0x22   : > { %5606 = sst [smem:[#allocation28_spill]] %s5605_s28  ;;  %s48_s14 = sadd.s32 1, %s4571_s21 }
  0x23   : > { %s5607_s29 = scalar_select %p4713_p12, 1, 0 }
  0x24   : > { %p3866_p13 = pneg %p4713_p12  ;;  %p4730_p2 = scmp.ge.s32.totalorder %s48_s14, 2 }
  0x25   : > { %s5610_s3 = sld [smem:[#allocation32_spill]] }
  0x26   : > { %p4724_p1 = pnand %p3866_p13, %p5568_p3 }
  0x28   : > { %s5608_s13 = scalar_select %p4724_p1, 1, 0 }
  0x29   : > { %p4742_p7 = pneg %p4724_p1 }
  0x2b   : > { %s4247_s30 = scalar_lea.hbm %s5610_s3, 4096 }
  0x2c   : > { %p4248_p5 = scmp.ne.s32.totalorder %s5610_s3, %s4247_s30  ;;  %p4254_p13 = scmp.lt.u32.totalorder %s4247_s30, %s5610_s3 }
  0x2d   : > { %s5611_s10 = scalar_select %p4742_p7, 1, 0 }
  0x2e   : > { %p4250_p9 = pnand %p4742_p7, %p4248_p5 }
  0x30   : > { %p4251_p11 = pneg %p4250_p9 }
  0x32   : > { %p4256_p0 = pnand %p4254_p13, %p4251_p11 }
  0x34   : > { %4259 = shalt.err (!%p4256_p0)
}
  0x35   : > { %s4260_s11 = scalar_lea.vmem %s4717_s12, 4096  ;;  %p4268_p6 = scmp.lt.s32.totalorder %s4717_s12, %s4717_s12 }
  0x36   : > { %p4261_p3 = scmp.ne.s32.totalorder %s4717_s12, %s4260_s11  ;;  %p4269_p12 = scmp.lt.s32.totalorder %s4260_s11, %s4260_s11 }
  0x38   : > { %p4263_p10 = pnand %p4261_p3, %p4742_p7  ;;  %p4270_p5 = por %p4269_p12, %p4268_p6 }
  0x3a   : > { %p4264_p8 = pneg %p4263_p10 }
  0x3c   : > { %p4271_p9 = pnand %p4270_p5, %p4264_p8 }
  0x3e   : > { %4274 = shalt.err (!%p4271_p9)
}
  0x3f   : > { %s5573_s17 = smov 128   ;;  %s5576_s24 = smov 8  }
  0x40   : > { %3869 = dma.hbm_to_vmem [thread:$0]  (!%p4724_p1), %s5610_s3, 4096, %s4717_s12, [#allocation9], %s5573_s17, %s5573_s17, %s5576_s24  }
  0x41   : > { %s5652_s14 = smov (%p4730_p2, %s48_s14), 0  ;;  %p3899_p3 = scmp.lt.s32.totalorder %s4575_s22, 2 }
  0x42   : > { %5612 = sst [smem:[#allocation29_spill]] %s5652_s14  ;;  %s5575_s15 = sand.u32 1, %s4563_s19  }
  0x43   : > { %s52_s30 = ssub.s32 %s4571_s21, %s5652_s14  ;;  %s4776_s11 = sshll.u32 %s5575_s15, 8 }
  0x44   : > { %p55_p6 = scmp.eq.s32.totalorder %s52_s30, 0  ;;  %s4779_s9 = sshll.u32 %s4571_s21, 12 }
  0x45   : > { %p4783_p8 = pnand %p3899_p3, %p4690_p4  ;;  %s432_s12 = sand.u32 1, %s4575_s22  }
  0x46   : > { %s5614_s16 = sadd.s32 1, %s4563_s19  ;;  %s5616_s1 = sld [smem:[#allocation31_spill]] }
  0x47   : > { %s5613_s20 = scalar_select %p4783_p8, 1, 0 }
  0x48   : > { %s4791_s27 = scalar_select %p55_p6, %s4563_s19, %s5614_s16  }
  0x49   : > { %s436_s25 = scalar_lea.vmem [#allocation5], %s4776_s11  ;;  %s4580_s24 = smov [#allocation10]  }
  0x4a   : > { %5615 = sst [smem:[#allocation30_spill]] %s4791_s27  ;;  %s446_s30 = sshll.u32 %s436_s25, 4  ;;  %s4800_s30 = int_to_ptr.vmem [resolvable:$true] %s446_s30 }
  0x4b   : > { %s4802_s3 = sshll.u32 %s4580_s24, 4  ;;  %s4804_s14 = scalar_lea.sflag [#allocation6], %s432_s12  ;;  %s376_s3 = int_to_ptr.vmem [resolvable:$true] %s4802_s3 }
  0x4c   : > { %s4797_s15 = scalar_lea.hbm %s5616_s1, %s4779_s9  ;;  %p4810_p10 = pneg %p4783_p8 }
  0x4d   : > { %s4275_s16 = scalar_lea.hbm %s4797_s15, 4096  ;;  %s4280_s21 = scalar_lea.hbm %s5616_s1, 8192 }
  0x4e   : > { %p4276_p4 = scmp.ne.s32.totalorder %s4797_s15, %s4275_s16  ;;  %p4281_p2 = scmp.lt.u32.totalorder %s4797_s15, %s5616_s1 }
  0x4f   : > { %s5617_s17 = scalar_select %p4810_p10, 1, 0 }
  0x50   : > { %p4278_p12 = pnand %p4810_p10, %p4276_p4  ;;  %p4282_p11 = scmp.lt.u32.totalorder %s4280_s21, %s4275_s16 }
  0x51   : > { %p4284_p5 = scmp.lt.u32.totalorder %s4275_s16, %s4797_s15 }
  0x52   : > { %p4279_p0 = pneg %p4278_p12  ;;  %p4283_p13 = por %p4282_p11, %p4281_p2 }
  0x54   : > { %p4285_p9 = por %p4284_p5, %p4283_p13 }
  0x56   : > { %p4286_p3 = pnand %p4285_p9, %p4279_p0 }
  0x58   : > { %4289 = shalt.err (!%p4286_p3)
}
  0x59   : > { %s4290_s12 = scalar_lea.vmem %s4800_s30, 4096  ;;  %s4581_s28 = smov [#allocation5]  }
  0x5a   : > { %p4291_p6 = scmp.ne.s32.totalorder %s4800_s30, %s4290_s12  ;;  %s4295_s25 = sshll.u32 %s4581_s28, 4  ;;  %s4296_s25 = int_to_ptr.vmem [resolvable:$false] %s4295_s25 }
  0x5b   : > { %s4297_s27 = scalar_lea.vmem %s4296_s25, 8192  ;;  %p4298_p1 = scmp.lt.s32.totalorder %s4800_s30, %s4296_s25 }
  0x5c   : > { %p4293_p4 = pnand %p4291_p6, %p4810_p10  ;;  %p4299_p7 = scmp.lt.s32.totalorder %s4297_s27, %s4290_s12 }
  0x5e   : > { %p4294_p12 = pneg %p4293_p4  ;;  %p4300_p2 = por %p4299_p7, %p4298_p1 }
  0x60   : > { %p4301_p11 = pnand %p4300_p2, %p4294_p12 }
  0x62   : > { %4304 = shalt.err (!%p4301_p11)
}
  0x63   : > { %s5618_s21 = smov 8   ;;  %s5619_s16 = smov 128  }
  0x64   : > { %3882 = dma.hbm_to_vmem [thread:$0]  (!%p4783_p8), %s4797_s15, 4096, %s4800_s30, %s4804_s14, %s5619_s16, %s5619_s16, %s5618_s21  }
  0x65   : > { %s4305_s25 = scalar_lea.hbm %s5554_s5, 4096  ;;  %p5620_p7 = scmp.ne.s32.totalorder %s5611_s10, 0 }
  0x66   : > { %p4306_p1 = scmp.ne.s32.totalorder %s5554_s5, %s4305_s25  ;;  %p4312_p5 = scmp.lt.u32.totalorder %s4305_s25, %s5554_s5 }
  0x68   : > { %p4308_p0 = pnand %p4306_p1, %p5620_p7 }
  0x6a   : > { %p4309_p13 = pneg %p4308_p0 }
  0x6c   : > { %p4314_p9 = pnand %p4312_p5, %p4309_p13 }
  0x6e   : > { %4317 = shalt.err (!%p4314_p9)
}
  0x6f   : > { %s4318_s8 = scalar_lea.vmem %s376_s3, 4096  ;;  %p4326_p12 = scmp.lt.s32.totalorder %s376_s3, %s376_s3 }
  0x70   : > { %p4319_p3 = scmp.ne.s32.totalorder %s376_s3, %s4318_s8  ;;  %p4327_p2 = scmp.lt.s32.totalorder %s4318_s8, %s4318_s8 }
  0x72   : > { %p4321_p6 = pnand %p4319_p3, %p5620_p7  ;;  %p4328_p11 = por %p4327_p2, %p4326_p12 }
  0x74   : > { %p4322_p4 = pneg %p4321_p6 }
  0x76   : > { %p4329_p8 = pnand %p4328_p11, %p4322_p4 }
  0x78   : > { %4332 = shalt.err (!%p4329_p8)
}
  0x79   : > { %p5621_p1 = scmp.ne.s32.totalorder %s5608_s13, 0  ;;  %s4582_s15 = smov [#allocation11]  }
  0x7a   : > { %s391_s30 = sshll.u32 %s4582_s15, 4  ;;  %s4333_s8 = scalar_lea.hbm %s5556_s7, 4096  ;;  %s392_s30 = int_to_ptr.vmem [resolvable:$true] %s391_s30 }
  0x7b   : > { %3872 = dma.hbm_to_vmem [thread:$0]  (!%p5621_p1), %s5554_s5, 4096, %s376_s3, [#allocation9], %s5619_s16, %s5619_s16, %s5618_s21  }
  0x7c   : > { %p4334_p8 = scmp.ne.s32.totalorder %s5556_s7, %s4333_s8  ;;  %p4340_p5 = scmp.lt.u32.totalorder %s4333_s8, %s5556_s7 }
  0x7e   : > { %p4336_p0 = pnand %p4334_p8, %p5620_p7 }
  0x80   : > { %p4337_p13 = pneg %p4336_p0 }
  0x82   : > { %p4342_p9 = pnand %p4340_p5, %p4337_p13 }
  0x84   : > { %4345 = shalt.err (!%p4342_p9)
}
  0x85   : > { %s4346_s3 = scalar_lea.vmem %s392_s30, 4096  ;;  %p4354_p12 = scmp.lt.s32.totalorder %s392_s30, %s392_s30 }
  0x86   : > { %p4347_p3 = scmp.ne.s32.totalorder %s392_s30, %s4346_s3  ;;  %p4355_p2 = scmp.lt.s32.totalorder %s4346_s3, %s4346_s3 }
  0x88   : > { %p4349_p6 = pnand %p4347_p3, %p5620_p7  ;;  %p4356_p11 = por %p4355_p2, %p4354_p12 }
  0x8a   : > { %p4350_p4 = pneg %p4349_p6 }
  0x8c   : > { %p4357_p10 = pnand %p4356_p11, %p4350_p4 }
  0x8e   : > { %4360 = shalt.err (!%p4357_p10)
}
  0x8f   : > { %3875 = dma.hbm_to_vmem [thread:$0]  (!%p5621_p1), %s5556_s7, 4096, %s392_s30, [#allocation12], %s5619_s16, %s5619_s16, %s5618_s21  }
  0x90   : > { %s4884_s15 = scalar_lea.hbm %s5549_s0, %s4779_s9  ;;  %s412_s13 = scalar_lea.vmem [#allocation2], %s4776_s11 }
  0x91   : > { %s422_s24 = sshll.u32 %s412_s13, 4  ;;  %s5622_s28 = sand.u32 1, %s4563_s19   ;;  %s4887_s24 = int_to_ptr.vmem [resolvable:$true] %s422_s24 }
  0x92   : > { %s4891_s8 = scalar_lea.sflag [#allocation3], %s5622_s28  ;;  %s4361_s25 = scalar_lea.hbm %s4884_s15, 4096 }
  0x93   : > { %p4362_p10 = scmp.ne.s32.totalorder %s4884_s15, %s4361_s25  ;;  %p5623_p7 = scmp.ne.s32.totalorder %s5617_s17, 0 }
  0x94   : > { %s4366_s27 = scalar_lea.hbm %s5549_s0, 8192  ;;  %p4367_p0 = scmp.lt.u32.totalorder %s4884_s15, %s5549_s0 }
  0x95   : > { %p4364_p1 = pnand %p4362_p10, %p5623_p7  ;;  %p4368_p13 = scmp.lt.u32.totalorder %s4366_s27, %s4361_s25 }
  0x96   : > { %p4370_p9 = scmp.lt.u32.totalorder %s4361_s25, %s4884_s15 }
  0x97   : > { %p4365_p8 = pneg %p4364_p1  ;;  %p4369_p5 = por %p4368_p13, %p4367_p0 }
  0x99   : > { %p4371_p3 = por %p4370_p9, %p4369_p5 }
  0x9b   : > { %p4372_p6 = pnand %p4371_p3, %p4365_p8 }
  0x9d   : > { %4375 = shalt.err (!%p4372_p6)
}
  0x9e   : > { %s4376_s1 = scalar_lea.vmem %s4887_s24, 4096  ;;  %s4583_s10 = smov [#allocation2]  }
  0x9f   : > { %p4377_p4 = scmp.ne.s32.totalorder %s4887_s24, %s4376_s1  ;;  %s4381_s22 = sshll.u32 %s4583_s10, 4  ;;  %s4382_s22 = int_to_ptr.vmem [resolvable:$false] %s4381_s22 }
  0xa0   : > { %s4383_s13 = scalar_lea.vmem %s4382_s22, 8192  ;;  %p4384_p11 = scmp.lt.s32.totalorder %s4887_s24, %s4382_s22 }
  0xa1   : > { %p4379_p12 = pnand %p4377_p4, %p5623_p7  ;;  %p4385_p10 = scmp.lt.s32.totalorder %s4383_s13, %s4376_s1 }
  0xa3   : > { %p4380_p2 = pneg %p4379_p12  ;;  %p4386_p1 = por %p4385_p10, %p4384_p11 }
  0xa5   : > { %p4387_p0 = pnand %p4386_p1, %p4380_p2 }
  0xa7   : > { %4390 = shalt.err (!%p4387_p0)
}
  0xa8   : > { %p5624_p8 = scmp.ne.s32.totalorder %s5613_s20, 0  ;;  %s4922_s30 = scalar_lea.hbm %s5551_s2, %s4779_s9 }
  0xa9   : > { %s460_s12 = scalar_lea.vmem [#allocation7], %s4776_s11  ;;  %s4391_s3 = scalar_lea.hbm %s4922_s30, 4096 }
  0xaa   : > { %3879 = dma.hbm_to_vmem [thread:$0]  (!%p5624_p8), %s4884_s15, 4096, %s4887_s24, %s4891_s8, %s5619_s16, %s5619_s16, %s5618_s21  }
  0xab   : > { %s470_s27 = sshll.u32 %s460_s12, 4  ;;  %p4392_p13 = scmp.ne.s32.totalorder %s4922_s30, %s4391_s3  ;;  %s4925_s27 = int_to_ptr.vmem [resolvable:$true] %s470_s27 }
  0xac   : > { %s4396_s24 = scalar_lea.hbm %s5551_s2, 8192  ;;  %p4397_p3 = scmp.lt.u32.totalorder %s4922_s30, %s5551_s2 }
  0xad   : > { %p4394_p5 = pnand %p4392_p13, %p5623_p7  ;;  %p4398_p6 = scmp.lt.u32.totalorder %s4396_s24, %s4391_s3 }
  0xae   : > { %p4400_p12 = scmp.lt.u32.totalorder %s4391_s3, %s4922_s30 }
  0xaf   : > { %p4395_p9 = pneg %p4394_p5  ;;  %p4399_p4 = por %p4398_p6, %p4397_p3 }
  0xb1   : > { %p4401_p2 = por %p4400_p12, %p4399_p4 }
  0xb3   : > { %p4402_p11 = pnand %p4401_p2, %p4395_p9 }
  0xb5   : > { %4405 = shalt.err (!%p4402_p11)
}
  0xb6   : > { %s4406_s11 = scalar_lea.vmem %s4925_s27, 4096  ;;  %s4584_s1 = smov [#allocation7]  }
  0xb7   : > { %p4407_p10 = scmp.ne.s32.totalorder %s4925_s27, %s4406_s11  ;;  %s4411_s10 = sshll.u32 %s4584_s1, 4  ;;  %s4412_s10 = int_to_ptr.vmem [resolvable:$false] %s4411_s10 }
  0xb8   : > { %s4413_s22 = scalar_lea.vmem %s4412_s10, 8192  ;;  %p4414_p13 = scmp.lt.s32.totalorder %s4925_s27, %s4412_s10 }
  0xb9   : > { %p4409_p1 = pnand %p4407_p10, %p5623_p7  ;;  %p4415_p5 = scmp.lt.s32.totalorder %s4413_s22, %s4406_s11 }
  0xbb   : > { %p4410_p0 = pneg %p4409_p1  ;;  %p4416_p3 = por %p4415_p5, %p4414_p13 }
  0xbd   : > { %p4417_p6 = pnand %p4416_p3, %p4410_p0 }
  0xbf   : > { %4420 = shalt.err (!%p4417_p6)
}
  0xc0   : > { %3885 = dma.hbm_to_vmem [thread:$0]  (!%p5624_p8), %s4922_s30, 4096, %s4925_s27, %s4804_s14, %s5619_s16, %s5619_s16, %s5618_s21  }
  0xc1   : > { %p5625_p7 = scmp.ne.s32.totalorder %s5607_s29, 0 }
  0xc2   : > { %s4955_s17 = sand.u32 (!%p5625_p7), 1, %s4559_s18   ;;  %p5626_p9 = scmp.ne.s32.totalorder (!%p5625_p7), %s5602_s26, 0 }
  0xc3   : > { %482 = sbr.rel (%p5625_p7) target bundleno = 717 (0x2cd), region = 56  ;;  %s4958_s13 = sshll.u32 (!%p5625_p7), %s4955_s17, 8 }
  0xc4   : > { %s485_s20 = scalar_lea.sflag (!%p5625_p7), [#allocation3], %s4955_s17  ;;  %s4962_s28 = scalar_lea.vmem (!%p5625_p7), [#allocation2], %s4958_s13 }
  0xca   : > { %4530 = dma.done.wait (%p5626_p9), %s485_s20, 4096  }
  0xcb   : > { %4532 = vsyncadd (%p5626_p9), %s485_s20, 4294963200  ;;  %s493_s29 = sand.u32 1, %s4681_s23   ;;  %s4972_s21 = scalar_lea.vmem [#allocation5], %s4958_s13 }
  0xcc   : > { %s494_s14 = scalar_lea.sflag [#allocation6], %s493_s29 }
  0xcd   : > { %4534 = dma.done.wait (%p5626_p9), %s494_s14, 8192  }
  0xce   : > { %4536 = vsyncadd (%p5626_p9), %s494_s14, 4294959104  ;;  %s4979_s16 = scalar_lea.vmem [#allocation7], %s4958_s13  ;;  %p5627_p8 = scmp.eq.s32.totalorder %s4681_s23, 0 }
  0xd0   : > { %4538 = dma.done.wait (%p5627_p8), [#allocation9], 8192   ;;  %p5628_p4 = pmov %p5627_p8 }
  0xd2   : > { %4540 = vsyncadd (%p5628_p4), [#allocation9], 4294959104  ;;  %p5629_p12 = pmov %p5628_p4 }
  0xd3   : > { %p5630_p2 = pmov %p5628_p4 }
  0xd4   : > { %4542 = dma.done.wait (%p5629_p12), [#allocation12], 4096  }
  0xd5   : > { %4544 = vsyncadd (%p5630_p2), [#allocation12], 4294963200  ;;  %v3959_v0 = vld [vmem:[#allocation8 + $0x4] ss:$8 sps:$4 sm:$0xff]   ;;  %v3961_v1 = vld [vmem:[#allocation8] ss:$8 sps:$4 sm:$0xff]  }
  0xd6   : > { %979 = vmatprep.subr.bf16.mxu0 %v3959_v0  ;;  %3810 = vmatprep.subr.bf16.mxu1 %v3959_v0  ;;  %v3962_v2 = vld [vmem:[#allocation8 + $0x14] ss:$8 sps:$4 sm:$0xff]   ;;  %v3964_v3 = vld [vmem:[#allocation8 + $0x10] ss:$8 sps:$4 sm:$0xff]   ;;  %v3965_v4 = vld [vmem:[#allocation8 + $0x24] ss:$8 sps:$4 sm:$0xff]  }
  0xd7   : > { %980 = vmatpush1.bf16.msra.mxu0 %v3961_v1  ;;  %3826 = vmatpush1.bf16.msra.mxu1 %v3961_v1  ;;  %v3967_v5 = vld [vmem:[#allocation8 + $0x20] ss:$8 sps:$4 sm:$0xff]   ;;  %v3968_v6 = vld [vmem:[#allocation8 + $0x34] ss:$8 sps:$4 sm:$0xff]   ;;  %v3970_v7 = vld [vmem:[#allocation8 + $0x30] ss:$8 sps:$4 sm:$0xff]  }
  0xd8   : > { %981 = vmatprep.subr.bf16.mxu0 %v3962_v2  ;;  %3811 = vmatprep.subr.bf16.mxu1 %v3962_v2  ;;  %v3971_v8 = vld [vmem:[#allocation8 + $0x44] ss:$8 sps:$4 sm:$0xff]   ;;  %v3973_v9 = vld [vmem:[#allocation8 + $0x40] ss:$8 sps:$4 sm:$0xff]   ;;  %v3974_v10 = vld [vmem:[#allocation8 + $0x54] ss:$8 sps:$4 sm:$0xff]  }
  0xd9   : > { %v3976_v11 = vld [vmem:[#allocation8 + $0x50] ss:$8 sps:$4 sm:$0xff]   ;;  %v3977_v12 = vld [vmem:[#allocation8 + $0x64] ss:$8 sps:$4 sm:$0xff]   ;;  %v3979_v14 = vld [vmem:[#allocation8 + $0x60] ss:$8 sps:$4 sm:$0xff]  }
  0xda   : > { %v4009_v13 = vld [vmem:[%s4962_s28 + $0x4] ss:$8 sps:$4 sm:$0xff]   ;;  %v3980_v16 = vld [vmem:[#allocation8 + $0x74] ss:$8 sps:$4 sm:$0xff]   ;;  %v3982_v17 = vld [vmem:[#allocation8 + $0x70] ss:$8 sps:$4 sm:$0xff]  }
  0xdb   : > { %982 = vmatpush1.bf16.msra.mxu0 %v3964_v3  ;;  %3827 = vmatpush1.bf16.msra.mxu1 %v3964_v3  ;;  %v4012_v15 = vld [vmem:[%s4962_s28 + $0x84] ss:$8 sps:$4 sm:$0xff]   ;;  %v3985_v19 = vld [vmem:[#allocation8 + $0x80] ss:$8 sps:$4 sm:$0xff]   ;;  %v3986_v20 = vld [vmem:[#allocation8 + $0x94] ss:$8 sps:$4 sm:$0xff]  }
  0xdc   : > { %983 = vmatprep.subr.bf16.mxu0 %v3965_v4  ;;  %3812 = vmatprep.subr.bf16.mxu1 %v3965_v4  ;;  %v3983_v18 = vld [vmem:[#allocation8 + $0x84] ss:$8 sps:$4 sm:$0xff]   ;;  %v3988_v21 = vld [vmem:[#allocation8 + $0x90] ss:$8 sps:$4 sm:$0xff]   ;;  %v3991_v23 = vld [vmem:[#allocation8 + $0xa0] ss:$8 sps:$4 sm:$0xff]  }
  0xdd   : > { %1011 = vmatprep.mubr.bf16.mxu0 %v4009_v13  ;;  %1091 = vmatprep.mubr.bf16.mxu1 %v4012_v15  ;;  %v3989_v22 = vld [vmem:[#allocation8 + $0xa4] ss:$8 sps:$4 sm:$0xff]   ;;  %v3992_v24 = vld [vmem:[#allocation8 + $0xb4] ss:$8 sps:$4 sm:$0xff]   ;;  %v3994_v25 = vld [vmem:[#allocation8 + $0xb0] ss:$8 sps:$4 sm:$0xff]  }
  0xde   : > { %v3995_v26 = vld [vmem:[#allocation8 + $0xc4] ss:$8 sps:$4 sm:$0xff]   ;;  %v3997_v27 = vld [vmem:[#allocation8 + $0xc0] ss:$8 sps:$4 sm:$0xff]   ;;  %v3998_v28 = vld [vmem:[#allocation8 + $0xd4] ss:$8 sps:$4 sm:$0xff]  }
  0xdf   : > { %984 = vmatpush1.bf16.msra.mxu0 %v3967_v5  ;;  %3828 = vmatpush1.bf16.msra.mxu1 %v3967_v5  ;;  %v4000_v29 = vld [vmem:[#allocation8 + $0xd0] ss:$8 sps:$4 sm:$0xff]   ;;  %v4001_v30 = vld [vmem:[#allocation8 + $0xe4] ss:$8 sps:$4 sm:$0xff]   ;;  %v4003_v31 = vld [vmem:[#allocation8 + $0xe0] ss:$8 sps:$4 sm:$0xff]  }
  0xe0   : > { %985 = vmatprep.subr.bf16.mxu0 %v3968_v6  ;;  %3813 = vmatprep.subr.bf16.mxu1 %v3968_v6  ;;  %v4004_v32 = vld [vmem:[#allocation8 + $0xf4] ss:$8 sps:$4 sm:$0xff]   ;;  %v4006_v33 = vld [vmem:[#allocation8 + $0xf0] ss:$8 sps:$4 sm:$0xff]   ;;  %v4015_v34 = vld [vmem:[#allocation10 + $0x4] ss:$8 sps:$4 sm:$0xff]  }
  0xe1   : > { %v4007_v35 = vld [vmem:[%s4962_s28] ss:$8 sps:$4 sm:$0xff]   ;;  %v4018_v36 = vld [vmem:[#allocation11 + $0x4] ss:$8 sps:$4 sm:$0xff]   ;;  %v4021_v40 = vld [vmem:[#allocation10 + $0x14] ss:$8 sps:$4 sm:$0xff]  }
  0xe2   : > { %v4010_v37 = vld [vmem:[%s4962_s28 + $0x80] ss:$8 sps:$4 sm:$0xff]   ;;  %v4024_v41 = vld [vmem:[#allocation11 + $0x14] ss:$8 sps:$4 sm:$0xff]   ;;  %v4019_v44 = vld [vmem:[#allocation10 + $0x10] ss:$8 sps:$4 sm:$0xff]  }
  0xe3   : > { %986 = vmatpush1.bf16.msra.mxu0 %v3970_v7  ;;  %3829 = vmatpush1.bf16.msra.mxu1 %v3970_v7  ;;  %v4013_v38 = vld [vmem:[#allocation10] ss:$8 sps:$4 sm:$0xff]   ;;  %v4025_v42 = vld [vmem:[%s4962_s28 + $0x14] ss:$8 sps:$4 sm:$0xff]   ;;  %v4022_v45 = vld [vmem:[#allocation11 + $0x10] ss:$8 sps:$4 sm:$0xff]  }
  0xe4   : > { %987 = vmatprep.subr.bf16.mxu0 %v3971_v8  ;;  %3814 = vmatprep.subr.bf16.mxu1 %v3971_v8  ;;  %v4016_v39 = vld [vmem:[#allocation11] ss:$8 sps:$4 sm:$0xff]   ;;  %v4027_v43 = vld [vmem:[%s4962_s28 + $0x94] ss:$8 sps:$4 sm:$0xff]   ;;  %v4033_v46 = vld [vmem:[#allocation10 + $0x24] ss:$8 sps:$4 sm:$0xff]  }
  0xe5   : > { %v4029_v47 = vld [vmem:[%s4962_s28 + $0x10] ss:$8 sps:$4 sm:$0xff]   ;;  %v4036_v48 = vld [vmem:[#allocation11 + $0x24] ss:$8 sps:$4 sm:$0xff]   ;;  %v4031_v50 = vld [vmem:[#allocation10 + $0x20] ss:$8 sps:$4 sm:$0xff]  }
  0xe6   : > { %v4030_v49 = vld [vmem:[%s4962_s28 + $0x90] ss:$8 sps:$4 sm:$0xff]   ;;  %v4034_v51 = vld [vmem:[#allocation11 + $0x20] ss:$8 sps:$4 sm:$0xff]   ;;  %v4039_v52 = vld [vmem:[#allocation10 + $0x34] ss:$8 sps:$4 sm:$0xff]  }
  0xe7   : > { %988 = vmatpush1.bf16.msra.mxu0 %v3973_v9  ;;  %3830 = vmatpush1.bf16.msra.mxu1 %v3973_v9  ;;  %v4042_v53 = vld [vmem:[#allocation11 + $0x34] ss:$8 sps:$4 sm:$0xff]   ;;  %v4043_v54 = vld [vmem:[%s4962_s28 + $0x24] ss:$8 sps:$4 sm:$0xff]   ;;  %v4037_v56 = vld [vmem:[#allocation10 + $0x30] ss:$8 sps:$4 sm:$0xff]  }
  0xe8   : > { %989 = vmatprep.subr.bf16.mxu0 %v3974_v10  ;;  %3815 = vmatprep.subr.bf16.mxu1 %v3974_v10  ;;  %v4045_v55 = vld [vmem:[%s4962_s28 + $0xa4] ss:$8 sps:$4 sm:$0xff]   ;;  %v4040_v57 = vld [vmem:[#allocation11 + $0x30] ss:$8 sps:$4 sm:$0xff]   ;;  %v4047_v59 = vld [vmem:[%s4962_s28 + $0x20] ss:$8 sps:$4 sm:$0xff]  }
  0xe9   : > { %v4051_v58 = vld [vmem:[#allocation10 + $0x44] ss:$8 sps:$4 sm:$0xff]   ;;  %v4048_v61 = vld [vmem:[%s4962_s28 + $0xa0] ss:$8 sps:$4 sm:$0xff]   ;;  %v4057_v0 = vld [vmem:[#allocation10 + $0x54] ss:$8 sps:$4 sm:$0xff]  }
  0xea   : > { %v4054_v60 = vld [vmem:[#allocation11 + $0x44] ss:$8 sps:$4 sm:$0xff]   ;;  %v4049_v62 = vld [vmem:[#allocation10 + $0x40] ss:$8 sps:$4 sm:$0xff]   ;;  %v4060_v1 = vld [vmem:[#allocation11 + $0x54] ss:$8 sps:$4 sm:$0xff]  }
  0xeb   : > { %990 = vmatpush1.bf16.msra.mxu0 %v3976_v11  ;;  %3831 = vmatpush1.bf16.msra.mxu1 %v3976_v11  ;;  %v4052_v63 = vld [vmem:[#allocation11 + $0x40] ss:$8 sps:$4 sm:$0xff]   ;;  %v4061_v2 = vld [vmem:[%s4962_s28 + $0x34] ss:$8 sps:$4 sm:$0xff]   ;;  %v4055_v4 = vld [vmem:[#allocation10 + $0x50] ss:$8 sps:$4 sm:$0xff]  }
  0xec   : > { %991 = vmatprep.subr.bf16.mxu0 %v3977_v12  ;;  %3816 = vmatprep.subr.bf16.mxu1 %v3977_v12  ;;  %v4063_v3 = vld [vmem:[%s4962_s28 + $0xb4] ss:$8 sps:$4 sm:$0xff]   ;;  %v4058_v5 = vld [vmem:[#allocation11 + $0x50] ss:$8 sps:$4 sm:$0xff]   ;;  %v4069_v6 = vld [vmem:[#allocation10 + $0x64] ss:$8 sps:$4 sm:$0xff]  }
  0xed   : > { %v4065_v7 = vld [vmem:[%s4962_s28 + $0x30] ss:$8 sps:$4 sm:$0xff]   ;;  %v4072_v8 = vld [vmem:[#allocation11 + $0x64] ss:$8 sps:$4 sm:$0xff]   ;;  %v4067_v10 = vld [vmem:[#allocation10 + $0x60] ss:$8 sps:$4 sm:$0xff]  }
  0xee   : > { %v4066_v9 = vld [vmem:[%s4962_s28 + $0xb0] ss:$8 sps:$4 sm:$0xff]   ;;  %v4070_v11 = vld [vmem:[#allocation11 + $0x60] ss:$8 sps:$4 sm:$0xff]   ;;  %v4075_v12 = vld [vmem:[#allocation10 + $0x74] ss:$8 sps:$4 sm:$0xff]  }
  0xef   : > { %992 = vmatpush1.bf16.msra.mxu0 %v3979_v14  ;;  %3832 = vmatpush1.bf16.msra.mxu1 %v3979_v14  ;;  %v4078_v13 = vld [vmem:[#allocation11 + $0x74] ss:$8 sps:$4 sm:$0xff]   ;;  %v4079_v14 = vld [vmem:[%s4962_s28 + $0x44] ss:$8 sps:$4 sm:$0xff]   ;;  %s5107_s30 = scalar_lea.vmem [#allocation13], %s4958_s13  ;;  %s5631_s3 = sld [smem:[#allocation33_spill]] }
  0xf0   : > { %993 = vmatprep.subr.bf16.mxu0 %v3980_v16  ;;  %3817 = vmatprep.subr.bf16.mxu1 %v3980_v16  ;;  %v4081_v15 = vld [vmem:[%s4962_s28 + $0xc4] ss:$8 sps:$4 sm:$0xff]   ;;  %v4073_v16 = vld [vmem:[#allocation10 + $0x70] ss:$8 sps:$4 sm:$0xff]   ;;  %s5632_s24 = sld [smem:[#allocation34_spill]]  ;;  %s5634_s10 = sld [smem:[#allocation35_spill]] }
  0xf1   : > { %s5633_s8 = sld [smem:[#allocation24_spill]]  ;;  %s5635_s20 = sld [smem:[#allocation27_spill]] }
  0xf2   : > { %s5236_s14 = scalar_lea.vmem [#allocation14], %s4958_s13  ;;  %s4585_s25 = smov [#allocation13]  }
  0xf3   : > { %994 = vmatpush1.bf16.msra.mxu0 %v3982_v17  ;;  %3833 = vmatpush1.bf16.msra.mxu1 %v3982_v17  ;;  %v4076_v17 = vld [vmem:[#allocation11 + $0x70] ss:$8 sps:$4 sm:$0xff]  }
  0xf4   : > { %995 = vmatprep.subr.bf16.mxu0 %v3983_v18  ;;  %3818 = vmatprep.subr.bf16.mxu1 %v3983_v18  ;;  %v4083_v18 = vld [vmem:[%s4962_s28 + $0x40] ss:$8 sps:$4 sm:$0xff]  }
  0xf7   : > { %996 = vmatpush1.bf16.msra.mxu0 %v3985_v19  ;;  %3834 = vmatpush1.bf16.msra.mxu1 %v3985_v19  ;;  %v4087_v19 = vld [vmem:[#allocation10 + $0x84] ss:$8 sps:$4 sm:$0xff]   ;;  %s5214_s9 = sshll.u32 %s5633_s8, 12  ;;  %p5636_p10 = scmp.ne.s32.totalorder %s5635_s20, 0 }
  0xf8   : > { %997 = vmatprep.subr.bf16.mxu0 %v3986_v20  ;;  %3819 = vmatprep.subr.bf16.mxu1 %v3986_v20  ;;  %v4090_v20 = vld [vmem:[#allocation11 + $0x84] ss:$8 sps:$4 sm:$0xff]   ;;  %s5228_s22 = scalar_lea.hbm %s5634_s10, %s5214_s9 }
  0xfb   : > { %998 = vmatpush1.bf16.msra.mxu0 %v3988_v21  ;;  %3835 = vmatpush1.bf16.msra.mxu1 %v3988_v21  ;;  %v4084_v21 = vld [vmem:[%s4962_s28 + $0xc0] ss:$8 sps:$4 sm:$0xff]  }
  0xfc   : > { %999 = vmatprep.subr.bf16.mxu0 %v3989_v22  ;;  %3820 = vmatprep.subr.bf16.mxu1 %v3989_v22  ;;  %v4085_v22 = vld [vmem:[#allocation10 + $0x80] ss:$8 sps:$4 sm:$0xff]  }
  0xff   : > { %1000 = vmatpush1.bf16.msra.mxu0 %v3991_v23  ;;  %3836 = vmatpush1.bf16.msra.mxu1 %v3991_v23  ;;  %v4088_v23 = vld [vmem:[#allocation11 + $0x80] ss:$8 sps:$4 sm:$0xff]  }
 0x100   : > { %1001 = vmatprep.subr.bf16.mxu0 %v3992_v24  ;;  %3821 = vmatprep.subr.bf16.mxu1 %v3992_v24  ;;  %v4093_v24 = vld [vmem:[#allocation10 + $0x94] ss:$8 sps:$4 sm:$0xff]  }
 0x103   : > { %1002 = vmatpush1.bf16.msra.mxu0 %v3994_v25  ;;  %3837 = vmatpush1.bf16.msra.mxu1 %v3994_v25  ;;  %v4096_v25 = vld [vmem:[#allocation11 + $0x94] ss:$8 sps:$4 sm:$0xff]  }
 0x104   : > { %1003 = vmatprep.subr.bf16.mxu0 %v3995_v26  ;;  %3822 = vmatprep.subr.bf16.mxu1 %v3995_v26  ;;  %v4097_v26 = vld [vmem:[%s4962_s28 + $0x54] ss:$8 sps:$4 sm:$0xff]  }
 0x107   : > { %1004 = vmatpush1.bf16.msra.mxu0 %v3997_v27  ;;  %3838 = vmatpush1.bf16.msra.mxu1 %v3997_v27  ;;  %v4099_v27 = vld [vmem:[%s4962_s28 + $0xd4] ss:$8 sps:$4 sm:$0xff]  }
 0x108   : > { %1005 = vmatprep.subr.bf16.mxu0 %v3998_v28  ;;  %3823 = vmatprep.subr.bf16.mxu1 %v3998_v28  ;;  %v4091_v28 = vld [vmem:[#allocation10 + $0x90] ss:$8 sps:$4 sm:$0xff]  }
 0x10b   : > { %1006 = vmatpush1.bf16.msra.mxu0 %v4000_v29  ;;  %3839 = vmatpush1.bf16.msra.mxu1 %v4000_v29  ;;  %v4094_v29 = vld [vmem:[#allocation11 + $0x90] ss:$8 sps:$4 sm:$0xff]  }
 0x10c   : > { %1007 = vmatprep.subr.bf16.mxu0 %v4001_v30  ;;  %3824 = vmatprep.subr.bf16.mxu1 %v4001_v30  ;;  %v4101_v30 = vld [vmem:[%s4962_s28 + $0x50] ss:$8 sps:$4 sm:$0xff]  }
 0x10f   : > { %1008 = vmatpush1.bf16.msra.mxu0 %v4003_v31  ;;  %3840 = vmatpush1.bf16.msra.mxu1 %v4003_v31  ;;  %v4105_v31 = vld [vmem:[#allocation10 + $0xa4] ss:$8 sps:$4 sm:$0xff]  }
 0x110   : > { %1009 = vmatprep.subr.bf16.mxu0 %v4004_v32  ;;  %3825 = vmatprep.subr.bf16.mxu1 %v4004_v32  ;;  %v4108_v32 = vld [vmem:[#allocation11 + $0xa4] ss:$8 sps:$4 sm:$0xff]  }
 0x113   : > { %1010 = vmatpush1.bf16.msra.mxu0 %v4006_v33  ;;  %3841 = vmatpush1.bf16.msra.mxu1 %v4006_v33  ;;  %v4102_v33 = vld [vmem:[%s4962_s28 + $0xd0] ss:$8 sps:$4 sm:$0xff]  }
 0x114   : > { %1856 = vmatprep.subr.bf16.mxu1 %v4015_v34  ;;  %2669 = vmatprep.subr.bf16.mxu0 %v4018_v36  ;;  %v4103_v34 = vld [vmem:[#allocation10 + $0xa0] ss:$8 sps:$4 sm:$0xff]   ;;  %v4111_v36 = vld [vmem:[#allocation10 + $0xb4] ss:$8 sps:$4 sm:$0xff]  }
 0x116   : > { %1012 = vmatmul.mubr.bf16.vlgmr.msra.gmra.mrb[0].mxu0 %v4007_v35  ;;  %1092 = vmatmul.mubr.bf16.vlgmr.msra.gmra.mrb[0].mxu1 %v4010_v37  ;;  %v4106_v35 = vld [vmem:[#allocation11 + $0xa0] ss:$8 sps:$4 sm:$0xff]   ;;  %v4114_v37 = vld [vmem:[#allocation11 + $0xb4] ss:$8 sps:$4 sm:$0xff]  }
 0x117   : > { %1857 = vmatpush1.bf16.msra.mxu1 %v4013_v38  ;;  %2670 = vmatpush1.bf16.msra.mxu0 %v4016_v39  ;;  %v4115_v38 = vld [vmem:[%s4962_s28 + $0x64] ss:$8 sps:$4 sm:$0xff]  }
 0x118   : > { %1858 = vmatprep.subr.bf16.mxu1 %v4021_v40  ;;  %2671 = vmatprep.subr.bf16.mxu0 %v4024_v41  ;;  %v4117_v39 = vld [vmem:[%s4962_s28 + $0xe4] ss:$8 sps:$4 sm:$0xff]   ;;  %v4109_v40 = vld [vmem:[#allocation10 + $0xb0] ss:$8 sps:$4 sm:$0xff]  }
 0x119   : > { %1021 = vmatprep.mubr.bf16.mxu0 %v4025_v42  ;;  %1101 = vmatprep.mubr.bf16.mxu1 %v4027_v43  ;;  %v4112_v41 = vld [vmem:[#allocation11 + $0xb0] ss:$8 sps:$4 sm:$0xff]   ;;  %v4119_v42 = vld [vmem:[%s4962_s28 + $0x60] ss:$8 sps:$4 sm:$0xff]   ;;  %v4123_v43 = vld [vmem:[#allocation10 + $0xc4] ss:$8 sps:$4 sm:$0xff]  }
 0x11b   : > { %1859 = vmatpush1.bf16.msra.mxu1 %v4019_v44  ;;  %2672 = vmatpush1.bf16.msra.mxu0 %v4022_v45  ;;  %v4126_v44 = vld [vmem:[#allocation11 + $0xc4] ss:$8 sps:$4 sm:$0xff]   ;;  %v4120_v45 = vld [vmem:[%s4962_s28 + $0xe0] ss:$8 sps:$4 sm:$0xff]  }
 0x11c   : > { %1860 = vmatprep.subr.bf16.mxu1 %v4033_v46  ;;  %2673 = vmatprep.subr.bf16.mxu0 %v4036_v48  ;;  %v4121_v46 = vld [vmem:[#allocation10 + $0xc0] ss:$8 sps:$4 sm:$0xff]   ;;  %v4129_v48 = vld [vmem:[#allocation10 + $0xd4] ss:$8 sps:$4 sm:$0xff]  }
 0x11e   : > { %1022 = vmatmul.mubr.bf16.gmra.mrb[4].mxu0 %v4029_v47  ;;  %1102 = vmatmul.mubr.bf16.gmra.mrb[4].mxu1 %v4030_v49  ;;  %v4124_v47 = vld [vmem:[#allocation11 + $0xc0] ss:$8 sps:$4 sm:$0xff]   ;;  %v4132_v49 = vld [vmem:[#allocation11 + $0xd4] ss:$8 sps:$4 sm:$0xff]  }
 0x11f   : > { %1861 = vmatpush1.bf16.msra.mxu1 %v4031_v50  ;;  %2674 = vmatpush1.bf16.msra.mxu0 %v4034_v51  ;;  %v4133_v50 = vld [vmem:[%s4962_s28 + $0x74] ss:$8 sps:$4 sm:$0xff]  }
 0x120   : > { %1862 = vmatprep.subr.bf16.mxu1 %v4039_v52  ;;  %2675 = vmatprep.subr.bf16.mxu0 %v4042_v53  ;;  %v4135_v51 = vld [vmem:[%s4962_s28 + $0xf4] ss:$8 sps:$4 sm:$0xff]   ;;  %v4127_v52 = vld [vmem:[#allocation10 + $0xd0] ss:$8 sps:$4 sm:$0xff]  }
 0x121   : > { %1031 = vmatprep.mubr.bf16.mxu0 %v4043_v54  ;;  %1111 = vmatprep.mubr.bf16.mxu1 %v4045_v55  ;;  %v4130_v53 = vld [vmem:[#allocation11 + $0xd0] ss:$8 sps:$4 sm:$0xff]   ;;  %v4141_v55 = vld [vmem:[#allocation10 + $0xe4] ss:$8 sps:$4 sm:$0xff]  }
 0x122   : > { %v4137_v54 = vld [vmem:[%s4962_s28 + $0x70] ss:$8 sps:$4 sm:$0xff]  }
 0x123   : > { %1863 = vmatpush1.bf16.msra.mxu1 %v4037_v56  ;;  %2676 = vmatpush1.bf16.msra.mxu0 %v4040_v57  ;;  %v4144_v56 = vld [vmem:[#allocation11 + $0xe4] ss:$8 sps:$4 sm:$0xff]   ;;  %v4138_v57 = vld [vmem:[%s4962_s28 + $0xf0] ss:$8 sps:$4 sm:$0xff]   ;;  %s3113_s28 = sshll.u32 %s5107_s30, 4  ;;  %s5233_s28 = int_to_ptr.vmem [resolvable:$true] %s3113_s28 }
 0x124   : > { %1864 = vmatprep.subr.bf16.mxu1 %v4051_v58  ;;  %2677 = vmatprep.subr.bf16.mxu0 %v4054_v60  ;;  %v4139_v58 = vld [vmem:[#allocation10 + $0xe0] ss:$8 sps:$4 sm:$0xff]   ;;  %v4147_v60 = vld [vmem:[#allocation10 + $0xf4] ss:$8 sps:$4 sm:$0xff]   ;;  %s4421_s26 = scalar_lea.vmem %s5233_s28, 4096 }
 0x125   : > { %p4422_p11 = scmp.ne.s32.totalorder %s5233_s28, %s4421_s26 }
 0x126   : > { %1032 = vmatmul.mubr.bf16.gmra.mrb[8].mxu0 %v4047_v59  ;;  %1112 = vmatmul.mubr.bf16.gmra.mrb[8].mxu1 %v4048_v61  ;;  %v4142_v59 = vld [vmem:[#allocation11 + $0xe0] ss:$8 sps:$4 sm:$0xff]   ;;  %v4150_v61 = vld [vmem:[#allocation11 + $0xf4] ss:$8 sps:$4 sm:$0xff]  }
 0x127   : > { %1865 = vmatpush1.bf16.msra.mxu1 %v4049_v62  ;;  %2678 = vmatpush1.bf16.msra.mxu0 %v4052_v63  ;;  %v4153_v62 = vld [vmem:[%s4972_s21 + $0x4] ss:$8 sps:$4 sm:$0xff]   ;;  %p4423_p1 = pnand %p4422_p11, %p5636_p10 }
 0x128   : > { %1866 = vmatprep.subr.bf16.mxu1 %v4057_v0  ;;  %2679 = vmatprep.subr.bf16.mxu0 %v4060_v1  ;;  %v4156_v63 = vld [vmem:[%s4979_s16 + $0x4] ss:$8 sps:$4 sm:$0xff]   ;;  %v4145_v0 = vld [vmem:[#allocation10 + $0xf0] ss:$8 sps:$4 sm:$0xff]  }
 0x129   : > { %1041 = vmatprep.mubr.bf16.mxu0 %v4061_v2  ;;  %1121 = vmatprep.mubr.bf16.mxu1 %v4063_v3  ;;  %v4148_v1 = vld [vmem:[#allocation11 + $0xf0] ss:$8 sps:$4 sm:$0xff]   ;;  %v4151_v2 = vld [vmem:[%s4972_s21] ss:$8 sps:$4 sm:$0xff]   ;;  %p4424_p0 = pneg %p4423_p1 }
 0x12a   : > { %v4154_v3 = vld [vmem:[%s4979_s16] ss:$8 sps:$4 sm:$0xff]  }
 0x12b   : > { %1867 = vmatpush1.bf16.msra.mxu1 %v4055_v4  ;;  %2680 = vmatpush1.bf16.msra.mxu0 %v4058_v5  ;;  %v4157_v4 = vld [vmem:[%s4972_s21 + $0x14] ss:$8 sps:$4 sm:$0xff]  }
 0x12c   : > { %1868 = vmatprep.subr.bf16.mxu1 %v4069_v6  ;;  %2681 = vmatprep.subr.bf16.mxu0 %v4072_v8  ;;  %v4159_v5 = vld [vmem:[%s4979_s16 + $0x14] ss:$8 sps:$4 sm:$0xff]   ;;  %v4161_v6 = vld [vmem:[%s4972_s21 + $0x10] ss:$8 sps:$4 sm:$0xff]   ;;  %v4163_v8 = vld [vmem:[%s4972_s21 + $0x24] ss:$8 sps:$4 sm:$0xff]  }
 0x12e   : > { %1042 = vmatmul.mubr.bf16.gmra.mrb[12].mxu0 %v4065_v7  ;;  %1122 = vmatmul.mubr.bf16.gmra.mrb[12].mxu1 %v4066_v9  ;;  %v4162_v7 = vld [vmem:[%s4979_s16 + $0x10] ss:$8 sps:$4 sm:$0xff]   ;;  %v4165_v9 = vld [vmem:[%s4979_s16 + $0x24] ss:$8 sps:$4 sm:$0xff]  }
 0x12f   : > { %1869 = vmatpush1.bf16.msra.mxu1 %v4067_v10  ;;  %2682 = vmatpush1.bf16.msra.mxu0 %v4070_v11  ;;  %v4167_v10 = vld [vmem:[%s4972_s21 + $0x20] ss:$8 sps:$4 sm:$0xff]  }
 0x130   : > { %1870 = vmatprep.subr.bf16.mxu1 %v4075_v12  ;;  %2683 = vmatprep.subr.bf16.mxu0 %v4078_v13  ;;  %v4168_v11 = vld [vmem:[%s4979_s16 + $0x20] ss:$8 sps:$4 sm:$0xff]   ;;  %v4169_v12 = vld [vmem:[%s4972_s21 + $0x34] ss:$8 sps:$4 sm:$0xff]  }
 0x131   : > { %1051 = vmatprep.mubr.bf16.mxu0 %v4079_v14  ;;  %1131 = vmatprep.mubr.bf16.mxu1 %v4081_v15  ;;  %v4171_v13 = vld [vmem:[%s4979_s16 + $0x34] ss:$8 sps:$4 sm:$0xff]   ;;  %v4173_v14 = vld [vmem:[%s4972_s21 + $0x30] ss:$8 sps:$4 sm:$0xff]  }
 0x132   : > { %v4174_v15 = vld [vmem:[%s4979_s16 + $0x30] ss:$8 sps:$4 sm:$0xff]  }
 0x133   : > { %1871 = vmatpush1.bf16.msra.mxu1 %v4073_v16  ;;  %2684 = vmatpush1.bf16.msra.mxu0 %v4076_v17  ;;  %v4175_v16 = vld [vmem:[%s4972_s21 + $0x44] ss:$8 sps:$4 sm:$0xff]  }
 0x134   : > { %1872 = vmatprep.subr.bf16.mxu1 %v4087_v19  ;;  %2685 = vmatprep.subr.bf16.mxu0 %v4090_v20  ;;  %v4177_v17 = vld [vmem:[%s4979_s16 + $0x44] ss:$8 sps:$4 sm:$0xff]   ;;  %v4180_v19 = vld [vmem:[%s4979_s16 + $0x40] ss:$8 sps:$4 sm:$0xff]   ;;  %v4181_v20 = vld [vmem:[%s4972_s21 + $0x54] ss:$8 sps:$4 sm:$0xff]  }
 0x136   : > { %1052 = vmatmul.mubr.bf16.gmra.mrb[16].mxu0 %v4083_v18  ;;  %1132 = vmatmul.mubr.bf16.gmra.mrb[16].mxu1 %v4084_v21  ;;  %v4179_v18 = vld [vmem:[%s4972_s21 + $0x40] ss:$8 sps:$4 sm:$0xff]   ;;  %v4183_v21 = vld [vmem:[%s4979_s16 + $0x54] ss:$8 sps:$4 sm:$0xff]  }
 0x137   : > { %1873 = vmatpush1.bf16.msra.mxu1 %v4085_v22  ;;  %2686 = vmatpush1.bf16.msra.mxu0 %v4088_v23  ;;  %v4185_v22 = vld [vmem:[%s4972_s21 + $0x50] ss:$8 sps:$4 sm:$0xff]  }
 0x138   : > { %1874 = vmatprep.subr.bf16.mxu1 %v4093_v24  ;;  %2687 = vmatprep.subr.bf16.mxu0 %v4096_v25  ;;  %v4186_v23 = vld [vmem:[%s4979_s16 + $0x50] ss:$8 sps:$4 sm:$0xff]   ;;  %v4187_v24 = vld [vmem:[%s4972_s21 + $0x64] ss:$8 sps:$4 sm:$0xff]  }
 0x139   : > { %1061 = vmatprep.mubr.bf16.mxu0 %v4097_v26  ;;  %1141 = vmatprep.mubr.bf16.mxu1 %v4099_v27  ;;  %v4189_v25 = vld [vmem:[%s4979_s16 + $0x64] ss:$8 sps:$4 sm:$0xff]   ;;  %v4191_v26 = vld [vmem:[%s4972_s21 + $0x60] ss:$8 sps:$4 sm:$0xff]  }
 0x13a   : > { %v4192_v27 = vld [vmem:[%s4979_s16 + $0x60] ss:$8 sps:$4 sm:$0xff]  }
 0x13b   : > { %1875 = vmatpush1.bf16.msra.mxu1 %v4091_v28  ;;  %2688 = vmatpush1.bf16.msra.mxu0 %v4094_v29  ;;  %v4193_v28 = vld [vmem:[%s4972_s21 + $0x74] ss:$8 sps:$4 sm:$0xff]  }
 0x13c   : > { %1876 = vmatprep.subr.bf16.mxu1 %v4105_v31  ;;  %2689 = vmatprep.subr.bf16.mxu0 %v4108_v32  ;;  %v4195_v29 = vld [vmem:[%s4979_s16 + $0x74] ss:$8 sps:$4 sm:$0xff]   ;;  %v4198_v31 = vld [vmem:[%s4979_s16 + $0x70] ss:$8 sps:$4 sm:$0xff]   ;;  %v4199_v32 = vld [vmem:[%s4972_s21 + $0x84] ss:$8 sps:$4 sm:$0xff]  }
 0x13e   : > { %1062 = vmatmul.mubr.bf16.gmra.mrb[20].mxu0 %v4101_v30  ;;  %1142 = vmatmul.mubr.bf16.gmra.mrb[20].mxu1 %v4102_v33  ;;  %v4197_v30 = vld [vmem:[%s4972_s21 + $0x70] ss:$8 sps:$4 sm:$0xff]   ;;  %v4201_v33 = vld [vmem:[%s4979_s16 + $0x84] ss:$8 sps:$4 sm:$0xff]  }
 0x13f   : > { %1877 = vmatpush1.bf16.msra.mxu1 %v4103_v34  ;;  %2690 = vmatpush1.bf16.msra.mxu0 %v4106_v35  ;;  %v4203_v34 = vld [vmem:[%s4972_s21 + $0x80] ss:$8 sps:$4 sm:$0xff]  }
 0x140   : > { %1878 = vmatprep.subr.bf16.mxu1 %v4111_v36  ;;  %2691 = vmatprep.subr.bf16.mxu0 %v4114_v37  ;;  %v4204_v35 = vld [vmem:[%s4979_s16 + $0x80] ss:$8 sps:$4 sm:$0xff]   ;;  %v4205_v36 = vld [vmem:[%s4972_s21 + $0x94] ss:$8 sps:$4 sm:$0xff]  }
 0x141   : > { %1071 = vmatprep.mubr.bf16.mxu0 %v4115_v38  ;;  %1151 = vmatprep.mubr.bf16.mxu1 %v4117_v39  ;;  %v4207_v37 = vld [vmem:[%s4979_s16 + $0x94] ss:$8 sps:$4 sm:$0xff]   ;;  %v4209_v38 = vld [vmem:[%s4972_s21 + $0x90] ss:$8 sps:$4 sm:$0xff]  }
 0x142   : > { %v4210_v39 = vld [vmem:[%s4979_s16 + $0x90] ss:$8 sps:$4 sm:$0xff]  }
 0x143   : > { %1879 = vmatpush1.bf16.msra.mxu1 %v4109_v40  ;;  %2692 = vmatpush1.bf16.msra.mxu0 %v4112_v41  ;;  %v4211_v40 = vld [vmem:[%s4972_s21 + $0xa4] ss:$8 sps:$4 sm:$0xff]  }
 0x144   : > { %1880 = vmatprep.subr.bf16.mxu1 %v4123_v43  ;;  %2693 = vmatprep.subr.bf16.mxu0 %v4126_v44  ;;  %v4213_v41 = vld [vmem:[%s4979_s16 + $0xa4] ss:$8 sps:$4 sm:$0xff]   ;;  %v4216_v43 = vld [vmem:[%s4979_s16 + $0xa0] ss:$8 sps:$4 sm:$0xff]   ;;  %v4217_v44 = vld [vmem:[%s4972_s21 + $0xb4] ss:$8 sps:$4 sm:$0xff]  }
 0x146   : > { %1072 = vmatmul.mubr.bf16.gmra.mrb[24].mxu0 %v4119_v42  ;;  %1152 = vmatmul.mubr.bf16.gmra.mrb[24].mxu1 %v4120_v45  ;;  %v4215_v42 = vld [vmem:[%s4972_s21 + $0xa0] ss:$8 sps:$4 sm:$0xff]   ;;  %v4219_v45 = vld [vmem:[%s4979_s16 + $0xb4] ss:$8 sps:$4 sm:$0xff]  }
 0x147   : > { %1881 = vmatpush1.bf16.msra.mxu1 %v4121_v46  ;;  %2694 = vmatpush1.bf16.msra.mxu0 %v4124_v47  ;;  %v4221_v46 = vld [vmem:[%s4972_s21 + $0xb0] ss:$8 sps:$4 sm:$0xff]  }
 0x148   : > { %1882 = vmatprep.subr.bf16.mxu1 %v4129_v48  ;;  %2695 = vmatprep.subr.bf16.mxu0 %v4132_v49  ;;  %v4222_v47 = vld [vmem:[%s4979_s16 + $0xb0] ss:$8 sps:$4 sm:$0xff]   ;;  %v4223_v48 = vld [vmem:[%s4972_s21 + $0xc4] ss:$8 sps:$4 sm:$0xff]  }
 0x149   : > { %1081 = vmatprep.mubr.bf16.mxu0 %v4133_v50  ;;  %1161 = vmatprep.mubr.bf16.mxu1 %v4135_v51  ;;  %v4225_v49 = vld [vmem:[%s4979_s16 + $0xc4] ss:$8 sps:$4 sm:$0xff]   ;;  %v4227_v50 = vld [vmem:[%s4972_s21 + $0xc0] ss:$8 sps:$4 sm:$0xff]  }
 0x14a   : > { %v4228_v51 = vld [vmem:[%s4979_s16 + $0xc0] ss:$8 sps:$4 sm:$0xff]  }
 0x14b   : > { %1883 = vmatpush1.bf16.msra.mxu1 %v4127_v52  ;;  %2696 = vmatpush1.bf16.msra.mxu0 %v4130_v53  ;;  %v4229_v52 = vld [vmem:[%s4972_s21 + $0xd4] ss:$8 sps:$4 sm:$0xff]  }
 0x14c   : > { %1884 = vmatprep.subr.bf16.mxu1 %v4141_v55  ;;  %2697 = vmatprep.subr.bf16.mxu0 %v4144_v56  ;;  %v4231_v53 = vld [vmem:[%s4979_s16 + $0xd4] ss:$8 sps:$4 sm:$0xff]   ;;  %v4234_v55 = vld [vmem:[%s4979_s16 + $0xd0] ss:$8 sps:$4 sm:$0xff]   ;;  %v4235_v56 = vld [vmem:[%s4972_s21 + $0xe4] ss:$8 sps:$4 sm:$0xff]  }
 0x14e   : > { %1082 = vmatmul.mubr.bf16.gmra.mrb[28].mxu0 %v4137_v54  ;;  %1162 = vmatmul.mubr.bf16.gmra.mrb[28].mxu1 %v4138_v57  ;;  %v4233_v54 = vld [vmem:[%s4972_s21 + $0xd0] ss:$8 sps:$4 sm:$0xff]   ;;  %v4237_v57 = vld [vmem:[%s4979_s16 + $0xe4] ss:$8 sps:$4 sm:$0xff]  }
 0x14f   : > { %1885 = vmatpush1.bf16.msra.mxu1 %v4139_v58  ;;  %2698 = vmatpush1.bf16.msra.mxu0 %v4142_v59  ;;  %v4239_v58 = vld [vmem:[%s4972_s21 + $0xe0] ss:$8 sps:$4 sm:$0xff]  }
 0x150   : > { %1886 = vmatprep.subr.bf16.mxu1 %v4147_v60  ;;  %2699 = vmatprep.subr.bf16.mxu0 %v4150_v61  ;;  %v4240_v59 = vld [vmem:[%s4979_s16 + $0xe0] ss:$8 sps:$4 sm:$0xff]   ;;  %v4241_v60 = vld [vmem:[%s4972_s21 + $0xf4] ss:$8 sps:$4 sm:$0xff]  }
 0x151   : > { %1888 = vmatprep.mubr.bf16.mxu1 %v4153_v62  ;;  %2701 = vmatprep.mubr.bf16.mxu0 %v4156_v63  ;;  %v4243_v61 = vld [vmem:[%s4979_s16 + $0xf4] ss:$8 sps:$4 sm:$0xff]   ;;  %v4245_v62 = vld [vmem:[%s4972_s21 + $0xf0] ss:$8 sps:$4 sm:$0xff]   ;;  %s5240_s21 = scalar_lea.vmem [#allocation16], %s4958_s13 }
 0x152   : > { %v4246_v63 = vld [vmem:[%s4979_s16 + $0xf0] ss:$8 sps:$4 sm:$0xff]   ;;  %s3087_s16 = scalar_lea.sflag [#allocation4], %s4955_s17 }
 0x153   : > { %1887 = vmatpush1.bf16.msra.mxu1 %v4145_v0  ;;  %2700 = vmatpush1.bf16.msra.mxu0 %v4148_v1  ;;  %v649_v0 = vlaneseq }
 0x155   : > { %v650_v1 = vshrl.u32 %v649_v0, 7 }
 0x156   : > { %1889 = vmatmul.mubr.bf16.vlgmr.msra.gmra.mrb[32].mxu1 %v4151_v2  ;;  %2702 = vmatmul.mubr.bf16.vlgmr.msra.gmra.mrb[32].mxu0 %v4154_v3  ;;  %v647_v3 = vld [vmem:[%s5553_s4] sm:$0x3] }
 0x157   : > { %1898 = vmatprep.mubr.bf16.mxu1 %v4157_v4  ;;  %2711 = vmatprep.mubr.bf16.mxu0 %v4159_v5  ;;  %v5085_v2 = vsub.s32 0, %v650_v1  ;;  %v5090_v4 = vsub.s32 1, %v650_v1 }
 0x159   : > { %v5093_v5 = vrot.slane %v647_v3, %v5085_v2 }
 0x15e   : > { %1899 = vmatmul.mubr.bf16.gmra.mrb[36].mxu1 %v4161_v6  ;;  %2712 = vmatmul.mubr.bf16.gmra.mrb[36].mxu0 %v4162_v7  ;;  %v5096_v6 = vrot.slane %v647_v3, %v5090_v4 }
 0x15f   : > { %1908 = vmatprep.mubr.bf16.mxu1 %v4163_v8  ;;  %2721 = vmatprep.mubr.bf16.mxu0 %v4165_v9 }
 0x166   : > { %1909 = vmatmul.mubr.bf16.gmra.mrb[40].mxu1 %v4167_v10  ;;  %2722 = vmatmul.mubr.bf16.gmra.mrb[40].mxu0 %v4168_v11 }
 0x167   : > { %1918 = vmatprep.mubr.bf16.mxu1 %v4169_v12  ;;  %2731 = vmatprep.mubr.bf16.mxu0 %v4171_v13 }
 0x16e   : > { %1919 = vmatmul.mubr.bf16.gmra.mrb[44].mxu1 %v4173_v14  ;;  %2732 = vmatmul.mubr.bf16.gmra.mrb[44].mxu0 %v4174_v15 }
 0x16f   : > { %1928 = vmatprep.mubr.bf16.mxu1 %v4175_v16  ;;  %2741 = vmatprep.mubr.bf16.mxu0 %v4177_v17 }
 0x176   : > { %1929 = vmatmul.mubr.bf16.gmra.mrb[48].mxu1 %v4179_v18  ;;  %2742 = vmatmul.mubr.bf16.gmra.mrb[48].mxu0 %v4180_v19 }
 0x177   : > { %1938 = vmatprep.mubr.bf16.mxu1 %v4181_v20  ;;  %2751 = vmatprep.mubr.bf16.mxu0 %v4183_v21 }
 0x17e   : > { %1939 = vmatmul.mubr.bf16.gmra.mrb[52].mxu1 %v4185_v22  ;;  %2752 = vmatmul.mubr.bf16.gmra.mrb[52].mxu0 %v4186_v23 }
 0x17f   : > { %1948 = vmatprep.mubr.bf16.mxu1 %v4187_v24  ;;  %2761 = vmatprep.mubr.bf16.mxu0 %v4189_v25 }
 0x186   : > { %1949 = vmatmul.mubr.bf16.gmra.mrb[56].mxu1 %v4191_v26  ;;  %2762 = vmatmul.mubr.bf16.gmra.mrb[56].mxu0 %v4192_v27 }
 0x187   : > { %1958 = vmatprep.mubr.bf16.mxu1 %v4193_v28  ;;  %2771 = vmatprep.mubr.bf16.mxu0 %v4195_v29 }
 0x18e   : > { %1959 = vmatmul.mubr.bf16.gmra.mrb[60].mxu1 %v4197_v30  ;;  %2772 = vmatmul.mubr.bf16.gmra.mrb[60].mxu0 %v4198_v31 }
 0x18f   : > { %1968 = vmatprep.mubr.bf16.mxu1 %v4199_v32  ;;  %2781 = vmatprep.mubr.bf16.mxu0 %v4201_v33 }
 0x196   : > { %1969 = vmatmul.mubr.bf16.gmra.mrb[64].mxu1 %v4203_v34  ;;  %2782 = vmatmul.mubr.bf16.gmra.mrb[64].mxu0 %v4204_v35 }
 0x197   : > { %1978 = vmatprep.mubr.bf16.mxu1 %v4205_v36  ;;  %2791 = vmatprep.mubr.bf16.mxu0 %v4207_v37 }
 0x19e   : > { %1979 = vmatmul.mubr.bf16.gmra.mrb[68].mxu1 %v4209_v38  ;;  %2792 = vmatmul.mubr.bf16.gmra.mrb[68].mxu0 %v4210_v39 }
 0x19f   : > { %1988 = vmatprep.mubr.bf16.mxu1 %v4211_v40  ;;  %2801 = vmatprep.mubr.bf16.mxu0 %v4213_v41 }
 0x1a6   : > { %1989 = vmatmul.mubr.bf16.gmra.mrb[72].mxu1 %v4215_v42  ;;  %2802 = vmatmul.mubr.bf16.gmra.mrb[72].mxu0 %v4216_v43 }
 0x1a7   : > { %1998 = vmatprep.mubr.bf16.mxu1 %v4217_v44  ;;  %2811 = vmatprep.mubr.bf16.mxu0 %v4219_v45 }
 0x1ae   : > { %1999 = vmatmul.mubr.bf16.gmra.mrb[76].mxu1 %v4221_v46  ;;  %2812 = vmatmul.mubr.bf16.gmra.mrb[76].mxu0 %v4222_v47 }
 0x1af   : > { %2008 = vmatprep.mubr.bf16.mxu1 %v4223_v48  ;;  %2821 = vmatprep.mubr.bf16.mxu0 %v4225_v49 }
 0x1b6   : > { %2009 = vmatmul.mubr.bf16.gmra.mrb[80].mxu1 %v4227_v50  ;;  %2822 = vmatmul.mubr.bf16.gmra.mrb[80].mxu0 %v4228_v51 }
 0x1b7   : > { %2018 = vmatprep.mubr.bf16.mxu1 %v4229_v52  ;;  %2831 = vmatprep.mubr.bf16.mxu0 %v4231_v53 }
 0x1be   : > { %2019 = vmatmul.mubr.bf16.gmra.mrb[84].mxu1 %v4233_v54  ;;  %2832 = vmatmul.mubr.bf16.gmra.mrb[84].mxu0 %v4234_v55 }
 0x1bf   : > { %2028 = vmatprep.mubr.bf16.mxu1 %v4235_v56  ;;  %2841 = vmatprep.mubr.bf16.mxu0 %v4237_v57 }
 0x1c6   : > { %2029 = vmatmul.mubr.bf16.gmra.mrb[88].mxu1 %v4239_v58  ;;  %2842 = vmatmul.mubr.bf16.gmra.mrb[88].mxu0 %v4240_v59 }
 0x1c7   : > { %2038 = vmatprep.mubr.bf16.mxu1 %v4241_v60  ;;  %2851 = vmatprep.mubr.bf16.mxu0 %v4243_v61 }
 0x1ce   : > { %2039 = vmatmul.mubr.bf16.gmra.mrb[92].mxu1 %v4245_v62  ;;  %2852 = vmatmul.mubr.bf16.gmra.mrb[92].mxu0 %v4246_v63 }
 0x1e9   : > { %v1013_v7 = vpop.f32.mrb[0].mxu0  ;;  %v1093_v8 = vpop.f32.mrb[0].mxu1 }
 0x1ea   : > { %v1014_v9 = vadd.f32 %v1013_v7, %v5093_v5  ;;  %v1094_v10 = vadd.f32 %v1093_v8, %v5093_v5  ;;  %v1015_v11 = vpop.f32.mrb[1].mxu0  ;;  %v1095_v12 = vpop.f32.mrb[1].mxu1 }
 0x1eb   : > { %v1016_v13 = vadd.f32 %v1015_v11, %v5096_v6  ;;  %v1096_v14 = vadd.f32 %v1095_v12, %v5096_v6  ;;  %v1017_v15 = vpop.f32.mrb[2].mxu0  ;;  %v1097_v16 = vpop.f32.mrb[2].mxu1 }
 0x1ec   : > { %v1172_v17 = vmul.f32 0.12751743, %v1014_v9  ;;  %v1204_v18 = vmul.f32 0.12751743, %v1094_v10  ;;  %v1018_v19 = vadd.f32 %v1017_v15, %v5093_v5  ;;  %v1098_v20 = vadd.f32 %v1097_v16, %v5093_v5  ;;  %v1019_v21 = vpop.f32.mrb[3].mxu0  ;;  %v1099_v22 = vpop.f32.mrb[3].mxu1 }
 0x1ed   : > { %v1173_v23 = vmul.f32 0.12751743, %v1016_v13  ;;  %v1205_v24 = vmul.f32 0.12751743, %v1096_v14  ;;  %v1020_v25 = vadd.f32 %v1019_v21, %v5096_v6  ;;  %v1100_v26 = vadd.f32 %v1099_v22, %v5096_v6 }
 0x1ee   : > { %v1174_v27 = vmul.f32 0.12751743, %v1018_v19  ;;  %v1206_v28 = vmul.f32 0.12751743, %v1098_v20 }
 0x1ef   : > { %v3711_v29 = vpack.c.bf16 %v1173_v23, %v1172_v17  ;;  %v3727_v30 = vpack.c.bf16 %v1205_v24, %v1204_v18  ;;  %v1175_v31 = vmul.f32 0.12751743, %v1020_v25  ;;  %v1207_v32 = vmul.f32 0.12751743, %v1100_v26 }
 0x1f1   : > { %1428 = vst [vmem:[%s5107_s30] sm:$0xff] %v3711_v29  ;;  %1444 = vst [vmem:[%s5107_s30 + $0x80] sm:$0xff] %v3727_v30  ;;  %v3712_v33 = vpack.c.bf16 %v1175_v31, %v1174_v27  ;;  %v3728_v34 = vpack.c.bf16 %v1207_v32, %v1206_v28  ;;  %v1023_v35 = vpop.f32.mrb[4].mxu0  ;;  %v1103_v36 = vpop.f32.mrb[4].mxu1 }
 0x1f2   : > { %v1024_v37 = vadd.f32 %v1023_v35, %v5093_v5  ;;  %v1104_v38 = vadd.f32 %v1103_v36, %v5093_v5  ;;  %v1025_v39 = vpop.f32.mrb[5].mxu0  ;;  %v1105_v40 = vpop.f32.mrb[5].mxu1 }
 0x1f3   : > { %1429 = vst [vmem:[%s5107_s30 + $0x8] sm:$0xff] %v3712_v33  ;;  %1445 = vst [vmem:[%s5107_s30 + $0x88] sm:$0xff] %v3728_v34  ;;  %v1026_v41 = vadd.f32 %v1025_v39, %v5096_v6  ;;  %v1106_v42 = vadd.f32 %v1105_v40, %v5096_v6  ;;  %v1027_v43 = vpop.f32.mrb[6].mxu0  ;;  %v1107_v44 = vpop.f32.mrb[6].mxu1 }
 0x1f4   : > { %v1176_v45 = vmul.f32 0.12751743, %v1024_v37  ;;  %v1208_v46 = vmul.f32 0.12751743, %v1104_v38  ;;  %v1028_v47 = vadd.f32 %v1027_v43, %v5093_v5  ;;  %v1108_v48 = vadd.f32 %v1107_v44, %v5093_v5  ;;  %v1029_v49 = vpop.f32.mrb[7].mxu0  ;;  %v1109_v50 = vpop.f32.mrb[7].mxu1 }
 0x1f5   : > { %v1177_v51 = vmul.f32 0.12751743, %v1026_v41  ;;  %v1209_v52 = vmul.f32 0.12751743, %v1106_v42  ;;  %v1030_v53 = vadd.f32 %v1029_v49, %v5096_v6  ;;  %v1110_v54 = vadd.f32 %v1109_v50, %v5096_v6 }
 0x1f6   : > { %v1178_v55 = vmul.f32 0.12751743, %v1028_v47  ;;  %v1210_v56 = vmul.f32 0.12751743, %v1108_v48 }
 0x1f7   : > { %v3713_v57 = vpack.c.bf16 %v1177_v51, %v1176_v45  ;;  %v3729_v58 = vpack.c.bf16 %v1209_v52, %v1208_v46  ;;  %v1179_v59 = vmul.f32 0.12751743, %v1030_v53  ;;  %v1211_v60 = vmul.f32 0.12751743, %v1110_v54 }
 0x1f9   : > { %1430 = vst [vmem:[%s5107_s30 + $0x10] sm:$0xff] %v3713_v57  ;;  %1446 = vst [vmem:[%s5107_s30 + $0x90] sm:$0xff] %v3729_v58  ;;  %v3714_v61 = vpack.c.bf16 %v1179_v59, %v1178_v55  ;;  %v3730_v62 = vpack.c.bf16 %v1211_v60, %v1210_v56  ;;  %v1033_v63 = vpop.f32.mrb[8].mxu0  ;;  %v1113_v0 = vpop.f32.mrb[8].mxu1 }
 0x1fa   : > { %v1034_v1 = vadd.f32 %v1033_v63, %v5093_v5  ;;  %v1114_v3 = vadd.f32 %v1113_v0, %v5093_v5  ;;  %v1035_v7 = vpop.f32.mrb[9].mxu0  ;;  %v1115_v8 = vpop.f32.mrb[9].mxu1 }
 0x1fb   : > { %1431 = vst [vmem:[%s5107_s30 + $0x18] sm:$0xff] %v3714_v61  ;;  %1447 = vst [vmem:[%s5107_s30 + $0x98] sm:$0xff] %v3730_v62  ;;  %v1036_v9 = vadd.f32 %v1035_v7, %v5096_v6  ;;  %v1116_v10 = vadd.f32 %v1115_v8, %v5096_v6  ;;  %v1037_v11 = vpop.f32.mrb[10].mxu0  ;;  %v1117_v12 = vpop.f32.mrb[10].mxu1 }
 0x1fc   : > { %v1180_v13 = vmul.f32 0.12751743, %v1034_v1  ;;  %v1212_v14 = vmul.f32 0.12751743, %v1114_v3  ;;  %v1038_v15 = vadd.f32 %v1037_v11, %v5093_v5  ;;  %v1118_v16 = vadd.f32 %v1117_v12, %v5093_v5  ;;  %v1039_v17 = vpop.f32.mrb[11].mxu0  ;;  %v1119_v18 = vpop.f32.mrb[11].mxu1 }
 0x1fd   : > { %v1181_v19 = vmul.f32 0.12751743, %v1036_v9  ;;  %v1213_v20 = vmul.f32 0.12751743, %v1116_v10  ;;  %v1040_v21 = vadd.f32 %v1039_v17, %v5096_v6  ;;  %v1120_v22 = vadd.f32 %v1119_v18, %v5096_v6 }
 0x1fe   : > { %v1182_v23 = vmul.f32 0.12751743, %v1038_v15  ;;  %v1214_v24 = vmul.f32 0.12751743, %v1118_v16 }
 0x1ff   : > { %v3715_v25 = vpack.c.bf16 %v1181_v19, %v1180_v13  ;;  %v3731_v26 = vpack.c.bf16 %v1213_v20, %v1212_v14  ;;  %v1183_v27 = vmul.f32 0.12751743, %v1040_v21  ;;  %v1215_v28 = vmul.f32 0.12751743, %v1120_v22 }
 0x201   : > { %1432 = vst [vmem:[%s5107_s30 + $0x20] sm:$0xff] %v3715_v25  ;;  %1448 = vst [vmem:[%s5107_s30 + $0xa0] sm:$0xff] %v3731_v26  ;;  %v3716_v29 = vpack.c.bf16 %v1183_v27, %v1182_v23  ;;  %v3732_v30 = vpack.c.bf16 %v1215_v28, %v1214_v24  ;;  %v1043_v31 = vpop.f32.mrb[12].mxu0  ;;  %v1123_v32 = vpop.f32.mrb[12].mxu1 }
 0x202   : > { %v1044_v33 = vadd.f32 %v1043_v31, %v5093_v5  ;;  %v1124_v34 = vadd.f32 %v1123_v32, %v5093_v5  ;;  %v1045_v35 = vpop.f32.mrb[13].mxu0  ;;  %v1125_v36 = vpop.f32.mrb[13].mxu1 }
 0x203   : > { %1433 = vst [vmem:[%s5107_s30 + $0x28] sm:$0xff] %v3716_v29  ;;  %1449 = vst [vmem:[%s5107_s30 + $0xa8] sm:$0xff] %v3732_v30  ;;  %v1046_v37 = vadd.f32 %v1045_v35, %v5096_v6  ;;  %v1126_v38 = vadd.f32 %v1125_v36, %v5096_v6  ;;  %v1047_v39 = vpop.f32.mrb[14].mxu0  ;;  %v1127_v40 = vpop.f32.mrb[14].mxu1 }
 0x204   : > { %v1184_v41 = vmul.f32 0.12751743, %v1044_v33  ;;  %v1216_v42 = vmul.f32 0.12751743, %v1124_v34  ;;  %v1048_v43 = vadd.f32 %v1047_v39, %v5093_v5  ;;  %v1128_v44 = vadd.f32 %v1127_v40, %v5093_v5  ;;  %v1049_v45 = vpop.f32.mrb[15].mxu0  ;;  %v1129_v46 = vpop.f32.mrb[15].mxu1 }
 0x205   : > { %v1185_v47 = vmul.f32 0.12751743, %v1046_v37  ;;  %v1217_v48 = vmul.f32 0.12751743, %v1126_v38  ;;  %v1050_v49 = vadd.f32 %v1049_v45, %v5096_v6  ;;  %v1130_v50 = vadd.f32 %v1129_v46, %v5096_v6 }
 0x206   : > { %v1186_v51 = vmul.f32 0.12751743, %v1048_v43  ;;  %v1218_v52 = vmul.f32 0.12751743, %v1128_v44 }
 0x207   : > { %v3717_v53 = vpack.c.bf16 %v1185_v47, %v1184_v41  ;;  %v3733_v54 = vpack.c.bf16 %v1217_v48, %v1216_v42  ;;  %v1187_v55 = vmul.f32 0.12751743, %v1050_v49  ;;  %v1219_v56 = vmul.f32 0.12751743, %v1130_v50 }
 0x209   : > { %1434 = vst [vmem:[%s5107_s30 + $0x30] sm:$0xff] %v3717_v53  ;;  %1450 = vst [vmem:[%s5107_s30 + $0xb0] sm:$0xff] %v3733_v54  ;;  %v3718_v57 = vpack.c.bf16 %v1187_v55, %v1186_v51  ;;  %v3734_v58 = vpack.c.bf16 %v1219_v56, %v1218_v52  ;;  %v1053_v59 = vpop.f32.mrb[16].mxu0  ;;  %v1133_v60 = vpop.f32.mrb[16].mxu1 }
 0x20a   : > { %v1054_v61 = vadd.f32 %v1053_v59, %v5093_v5  ;;  %v1134_v62 = vadd.f32 %v1133_v60, %v5093_v5  ;;  %v1055_v63 = vpop.f32.mrb[17].mxu0  ;;  %v1135_v0 = vpop.f32.mrb[17].mxu1 }
 0x20b   : > { %1435 = vst [vmem:[%s5107_s30 + $0x38] sm:$0xff] %v3718_v57  ;;  %1451 = vst [vmem:[%s5107_s30 + $0xb8] sm:$0xff] %v3734_v58  ;;  %v1056_v1 = vadd.f32 %v1055_v63, %v5096_v6  ;;  %v1136_v3 = vadd.f32 %v1135_v0, %v5096_v6  ;;  %v1057_v7 = vpop.f32.mrb[18].mxu0  ;;  %v1137_v8 = vpop.f32.mrb[18].mxu1 }
 0x20c   : > { %v1188_v9 = vmul.f32 0.12751743, %v1054_v61  ;;  %v1220_v10 = vmul.f32 0.12751743, %v1134_v62  ;;  %v1058_v11 = vadd.f32 %v1057_v7, %v5093_v5  ;;  %v1138_v12 = vadd.f32 %v1137_v8, %v5093_v5  ;;  %v1059_v13 = vpop.f32.mrb[19].mxu0  ;;  %v1139_v14 = vpop.f32.mrb[19].mxu1 }
 0x20d   : > { %v1189_v15 = vmul.f32 0.12751743, %v1056_v1  ;;  %v1221_v16 = vmul.f32 0.12751743, %v1136_v3  ;;  %v1060_v17 = vadd.f32 %v1059_v13, %v5096_v6  ;;  %v1140_v18 = vadd.f32 %v1139_v14, %v5096_v6 }
 0x20e   : > { %v1190_v19 = vmul.f32 0.12751743, %v1058_v11  ;;  %v1222_v20 = vmul.f32 0.12751743, %v1138_v12 }
 0x20f   : > { %v3719_v21 = vpack.c.bf16 %v1189_v15, %v1188_v9  ;;  %v3735_v22 = vpack.c.bf16 %v1221_v16, %v1220_v10  ;;  %v1191_v23 = vmul.f32 0.12751743, %v1060_v17  ;;  %v1223_v24 = vmul.f32 0.12751743, %v1140_v18 }
 0x211   : > { %1436 = vst [vmem:[%s5107_s30 + $0x40] sm:$0xff] %v3719_v21  ;;  %1452 = vst [vmem:[%s5107_s30 + $0xc0] sm:$0xff] %v3735_v22  ;;  %v3720_v25 = vpack.c.bf16 %v1191_v23, %v1190_v19  ;;  %v3736_v26 = vpack.c.bf16 %v1223_v24, %v1222_v20  ;;  %v1063_v27 = vpop.f32.mrb[20].mxu0  ;;  %v1143_v28 = vpop.f32.mrb[20].mxu1  ;;  %v1524_v21 = vld [vmem:[%s5631_s3] sm:$0x3] }
 0x212   : > { %v1064_v29 = vadd.f32 %v1063_v27, %v5093_v5  ;;  %v1144_v30 = vadd.f32 %v1143_v28, %v5093_v5  ;;  %v1065_v31 = vpop.f32.mrb[21].mxu0  ;;  %v1145_v32 = vpop.f32.mrb[21].mxu1  ;;  %v2337_v22 = vld [vmem:[%s5632_s24] sm:$0x3] }
 0x213   : > { %1437 = vst [vmem:[%s5107_s30 + $0x48] sm:$0xff] %v3720_v25  ;;  %1453 = vst [vmem:[%s5107_s30 + $0xc8] sm:$0xff] %v3736_v26  ;;  %v1066_v33 = vadd.f32 %v1065_v31, %v5096_v6  ;;  %v1146_v34 = vadd.f32 %v1145_v32, %v5096_v6  ;;  %v1067_v35 = vpop.f32.mrb[22].mxu0  ;;  %v1147_v36 = vpop.f32.mrb[22].mxu1 }
 0x214   : > { %v1192_v37 = vmul.f32 0.12751743, %v1064_v29  ;;  %v1224_v38 = vmul.f32 0.12751743, %v1144_v30  ;;  %v1068_v39 = vadd.f32 %v1067_v35, %v5093_v5  ;;  %v1148_v40 = vadd.f32 %v1147_v36, %v5093_v5  ;;  %v1069_v41 = vpop.f32.mrb[23].mxu0  ;;  %v1149_v42 = vpop.f32.mrb[23].mxu1 }
 0x215   : > { %v1193_v43 = vmul.f32 0.12751743, %v1066_v33  ;;  %v1225_v44 = vmul.f32 0.12751743, %v1146_v34  ;;  %v1070_v45 = vadd.f32 %v1069_v41, %v5096_v6  ;;  %v1150_v46 = vadd.f32 %v1149_v42, %v5096_v6 }
 0x216   : > { %v1194_v47 = vmul.f32 0.12751743, %v1068_v39  ;;  %v1226_v48 = vmul.f32 0.12751743, %v1148_v40  ;;  %v5196_v35 = vrot.slane %v1524_v21, %v5085_v2  ;;  %v5199_v36 = vrot.slane %v2337_v22, %v5085_v2 }
 0x217   : > { %v3721_v49 = vpack.c.bf16 %v1193_v43, %v1192_v37  ;;  %v3737_v50 = vpack.c.bf16 %v1225_v44, %v1224_v38  ;;  %v1195_v51 = vmul.f32 0.12751743, %v1070_v45  ;;  %v1227_v52 = vmul.f32 0.12751743, %v1150_v46 }
 0x219   : > { %1438 = vst [vmem:[%s5107_s30 + $0x50] sm:$0xff] %v3721_v49  ;;  %1454 = vst [vmem:[%s5107_s30 + $0xd0] sm:$0xff] %v3737_v50  ;;  %v3722_v53 = vpack.c.bf16 %v1195_v51, %v1194_v47  ;;  %v3738_v54 = vpack.c.bf16 %v1227_v52, %v1226_v48  ;;  %v1073_v55 = vpop.f32.mrb[24].mxu0  ;;  %v1153_v56 = vpop.f32.mrb[24].mxu1  ;;  %v5206_v48 = vrot.slane %v1524_v21, %v5090_v4 }
 0x21a   : > { %v1074_v57 = vadd.f32 %v1073_v55, %v5093_v5  ;;  %v1154_v58 = vadd.f32 %v1153_v56, %v5093_v5  ;;  %v1075_v59 = vpop.f32.mrb[25].mxu0  ;;  %v1155_v60 = vpop.f32.mrb[25].mxu1  ;;  %v5209_v49 = vrot.slane %v2337_v22, %v5090_v4 }
 0x21b   : > { %1439 = vst [vmem:[%s5107_s30 + $0x58] sm:$0xff] %v3722_v53  ;;  %1455 = vst [vmem:[%s5107_s30 + $0xd8] sm:$0xff] %v3738_v54  ;;  %v1076_v61 = vadd.f32 %v1075_v59, %v5096_v6  ;;  %v1156_v62 = vadd.f32 %v1155_v60, %v5096_v6  ;;  %v1077_v63 = vpop.f32.mrb[26].mxu0  ;;  %v1157_v0 = vpop.f32.mrb[26].mxu1 }
 0x21c   : > { %v1196_v1 = vmul.f32 0.12751743, %v1074_v57  ;;  %v1228_v3 = vmul.f32 0.12751743, %v1154_v58  ;;  %v1078_v7 = vadd.f32 %v1077_v63, %v5093_v5  ;;  %v1158_v8 = vadd.f32 %v1157_v0, %v5093_v5  ;;  %v1079_v9 = vpop.f32.mrb[27].mxu0  ;;  %v1159_v10 = vpop.f32.mrb[27].mxu1 }
 0x21d   : > { %v1197_v11 = vmul.f32 0.12751743, %v1076_v61  ;;  %v1229_v12 = vmul.f32 0.12751743, %v1156_v62  ;;  %v1080_v13 = vadd.f32 %v1079_v9, %v5096_v6  ;;  %v1160_v14 = vadd.f32 %v1159_v10, %v5096_v6 }
 0x21e   : > { %v1198_v15 = vmul.f32 0.12751743, %v1078_v7  ;;  %v1230_v16 = vmul.f32 0.12751743, %v1158_v8 }
 0x21f   : > { %v3723_v17 = vpack.c.bf16 %v1197_v11, %v1196_v1  ;;  %v3739_v18 = vpack.c.bf16 %v1229_v12, %v1228_v3  ;;  %v1199_v19 = vmul.f32 0.12751743, %v1080_v13  ;;  %v1231_v20 = vmul.f32 0.12751743, %v1160_v14 }
 0x221   : > { %1440 = vst [vmem:[%s5107_s30 + $0x60] sm:$0xff] %v3723_v17  ;;  %1456 = vst [vmem:[%s5107_s30 + $0xe0] sm:$0xff] %v3739_v18  ;;  %v3724_v23 = vpack.c.bf16 %v1199_v19, %v1198_v15  ;;  %v3740_v24 = vpack.c.bf16 %v1231_v20, %v1230_v16  ;;  %v1083_v25 = vpop.f32.mrb[28].mxu0  ;;  %v1163_v26 = vpop.f32.mrb[28].mxu1 }
 0x222   : > { %v1084_v27 = vadd.f32 %v1083_v25, %v5093_v5  ;;  %v1164_v28 = vadd.f32 %v1163_v26, %v5093_v5  ;;  %v1085_v29 = vpop.f32.mrb[29].mxu0  ;;  %v1165_v30 = vpop.f32.mrb[29].mxu1 }
 0x223   : > { %1441 = vst [vmem:[%s5107_s30 + $0x68] sm:$0xff] %v3724_v23  ;;  %1457 = vst [vmem:[%s5107_s30 + $0xe8] sm:$0xff] %v3740_v24  ;;  %v1086_v31 = vadd.f32 %v1085_v29, %v5096_v6  ;;  %v1166_v32 = vadd.f32 %v1165_v30, %v5096_v6  ;;  %v1087_v33 = vpop.f32.mrb[30].mxu0  ;;  %v1167_v34 = vpop.f32.mrb[30].mxu1 }
 0x224   : > { %v1200_v37 = vmul.f32 0.12751743, %v1084_v27  ;;  %v1232_v38 = vmul.f32 0.12751743, %v1164_v28  ;;  %v1088_v39 = vadd.f32 %v1087_v33, %v5093_v5  ;;  %v1168_v40 = vadd.f32 %v1167_v34, %v5093_v5  ;;  %v1089_v41 = vpop.f32.mrb[31].mxu0  ;;  %v1169_v42 = vpop.f32.mrb[31].mxu1 }
 0x225   : > { %v1201_v43 = vmul.f32 0.12751743, %v1086_v31  ;;  %v1233_v44 = vmul.f32 0.12751743, %v1166_v32  ;;  %v1090_v45 = vadd.f32 %v1089_v41, %v5096_v6  ;;  %v1170_v46 = vadd.f32 %v1169_v42, %v5096_v6 }
 0x226   : > { %v1202_v47 = vmul.f32 0.12751743, %v1088_v39  ;;  %v1234_v2 = vmul.f32 0.12751743, %v1168_v40 }
 0x227   : > { %v3725_v5 = vpack.c.bf16 %v1201_v43, %v1200_v37  ;;  %v3741_v50 = vpack.c.bf16 %v1233_v44, %v1232_v38  ;;  %v1203_v51 = vmul.f32 0.12751743, %v1090_v45  ;;  %v1235_v52 = vmul.f32 0.12751743, %v1170_v46 }
 0x229   : > { %1442 = vst [vmem:[%s5107_s30 + $0x70] sm:$0xff] %v3725_v5  ;;  %1458 = vst [vmem:[%s5107_s30 + $0xf0] sm:$0xff] %v3741_v50  ;;  %v3726_v53 = vpack.c.bf16 %v1203_v51, %v1202_v47  ;;  %v3742_v54 = vpack.c.bf16 %v1235_v52, %v1234_v2  ;;  %v1890_v55 = vpop.f32.mrb[32].mxu1  ;;  %v2703_v6 = vpop.f32.mrb[32].mxu0 }
 0x22a   : > { %v1891_v56 = vadd.f32 %v1890_v55, %v5196_v35  ;;  %v2704_v4 = vadd.f32 %v2703_v6, %v5199_v36  ;;  %v1892_v57 = vpop.f32.mrb[33].mxu1  ;;  %v2705_v58 = vpop.f32.mrb[33].mxu0 }
 0x22b   : > { %1443 = vst [vmem:[%s5107_s30 + $0x78] sm:$0xff] %v3726_v53  ;;  %1459 = vst [vmem:[%s5107_s30 + $0xf8] sm:$0xff] %v3742_v54  ;;  %v1893_v59 = vadd.f32 %v1892_v57, %v5206_v48  ;;  %v2706_v60 = vadd.f32 %v2705_v58, %v5209_v49  ;;  %v1894_v61 = vpop.f32.mrb[34].mxu1  ;;  %v2707_v62 = vpop.f32.mrb[34].mxu0  ;;  %s4425_s30 = sshll.u32 %s4585_s25, 4  ;;  %s4426_s30 = int_to_ptr.vmem [resolvable:$false] %s4425_s30 }
 0x22c   : > { %v1895_v63 = vadd.f32 %v1894_v61, %v5196_v35  ;;  %v2708_v0 = vadd.f32 %v2707_v62, %v5199_v36  ;;  %v1896_v1 = vpop.f32.mrb[35].mxu1  ;;  %v2709_v3 = vpop.f32.mrb[35].mxu0  ;;  %s4427_s12 = scalar_lea.vmem %s4426_s30, 8192  ;;  %p4428_p13 = scmp.lt.s32.totalorder %s5233_s28, %s4426_s30 }
 0x22d   : > { %v3743_v7 = vpack.c.bf16 %v1893_v59, %v1891_v56  ;;  %v3775_v8 = vpack.c.bf16 %v2706_v60, %v2704_v4  ;;  %v1897_v9 = vadd.f32 %v1896_v1, %v5206_v48  ;;  %v2710_v10 = vadd.f32 %v2709_v3, %v5209_v49  ;;  %p4429_p5 = scmp.lt.s32.totalorder %s4427_s12, %s4421_s26 }
 0x22f   : > { %2241 = vst [vmem:[%s5236_s14] sm:$0xff] %v3743_v7  ;;  %3054 = vst [vmem:[%s5240_s21] sm:$0xff] %v3775_v8  ;;  %v3744_v11 = vpack.c.bf16 %v1897_v9, %v1895_v63  ;;  %v3776_v12 = vpack.c.bf16 %v2710_v10, %v2708_v0  ;;  %p4430_p3 = por %p4429_p5, %p4428_p13 }
 0x231   : > { %p4431_p6 = pnand %p4430_p3, %p4424_p0 }
 0x233   : > { %4434 = shalt.err (!%p4431_p6)
}
 0x234   : > { %s4435_s13 = scalar_lea.hbm %s5228_s22, 4096  ;;  %s4439_s6 = scalar_lea.hbm %s5634_s10, 8192 }
 0x235   : > { %p4436_p7 = scmp.ne.s32.totalorder %s5228_s22, %s4435_s13  ;;  %p4440_p4 = scmp.lt.u32.totalorder %s5228_s22, %s5634_s10 }
 0x236   : > { %p4441_p12 = scmp.lt.u32.totalorder %s4439_s6, %s4435_s13  ;;  %p4443_p11 = scmp.lt.u32.totalorder %s4435_s13, %s5228_s22 }
 0x237   : > { %p4437_p9 = pnand %p4436_p7, %p5636_p10 }
 0x238   : > { %p4442_p2 = por %p4441_p12, %p4440_p4 }
 0x239   : > { %p4438_p8 = pneg %p4437_p9 }
 0x23a   : > { %p4444_p1 = por %p4443_p11, %p4442_p2 }
 0x23c   : > { %p4445_p0 = pnand %p4444_p1, %p4438_p8 }
 0x23e   : > { %4448 = shalt.err (!%p4445_p0)
}
 0x23f   : > { %s4586_s8 = smov 128   ;;  %s4587_s11 = smov 8   ;;  %2242 = vst [vmem:[%s5236_s14 + $0x8] sm:$0xff] %v3744_v11  ;;  %3055 = vst [vmem:[%s5240_s21 + $0x8] sm:$0xff] %v3776_v12  ;;  %v1900_v13 = vpop.f32.mrb[36].mxu1  ;;  %v2713_v14 = vpop.f32.mrb[36].mxu0 }
 0x240   : > { %3860 = dma.vmem_to_hbm [thread:$0]  (%p5636_p10), %s5233_s28, 4096, %s5228_s22, %s3087_s16, %s4586_s8, %s4586_s8, %s4587_s11   ;;  %v1901_v15 = vadd.f32 %v1900_v13, %v5196_v35  ;;  %v2714_v16 = vadd.f32 %v2713_v14, %v5199_v36  ;;  %v1902_v17 = vpop.f32.mrb[37].mxu1  ;;  %v2715_v18 = vpop.f32.mrb[37].mxu0 }
 0x241   : > { %v1903_v19 = vadd.f32 %v1902_v17, %v5206_v48  ;;  %v2716_v20 = vadd.f32 %v2715_v18, %v5209_v49  ;;  %v1904_v21 = vpop.f32.mrb[38].mxu1  ;;  %v2717_v22 = vpop.f32.mrb[38].mxu0  ;;  %s3132_s17 = sshll.u32 %s5236_s14, 4  ;;  %s3151_s1 = sshll.u32 %s5240_s21, 4  ;;  %s5458_s17 = int_to_ptr.vmem [resolvable:$true] %s3132_s17  ;;  %s5466_s1 = int_to_ptr.vmem [resolvable:$true] %s3151_s1 }
 0x242   : > { %v1905_v23 = vadd.f32 %v1904_v21, %v5196_v35  ;;  %v2718_v24 = vadd.f32 %v2717_v22, %v5199_v36  ;;  %v1906_v25 = vpop.f32.mrb[39].mxu1  ;;  %v2719_v26 = vpop.f32.mrb[39].mxu0  ;;  %s5637_s16 = sld [smem:[#allocation36_spill]]  ;;  %s5638_s12 = sld [smem:[#allocation37_spill]] }
 0x243   : > { %v3745_v27 = vpack.c.bf16 %v1903_v19, %v1901_v15  ;;  %v3777_v28 = vpack.c.bf16 %v2716_v20, %v2714_v16  ;;  %v1907_v29 = vadd.f32 %v1906_v25, %v5206_v48  ;;  %v2720_v30 = vadd.f32 %v2719_v26, %v5209_v49  ;;  %v1910_v33 = vpop.f32.mrb[40].mxu1  ;;  %v2723_v34 = vpop.f32.mrb[40].mxu0  ;;  %s5472_s27 = scalar_lea.sflag [#allocation15], %s493_s29  ;;  %s4449_s3 = scalar_lea.vmem %s5458_s17, 4096 }
 0x244   : > { %v1911_v37 = vadd.f32 %v1910_v33, %v5196_v35  ;;  %v2724_v38 = vadd.f32 %v2723_v34, %v5199_v36  ;;  %v1912_v39 = vpop.f32.mrb[41].mxu1  ;;  %v2725_v40 = vpop.f32.mrb[41].mxu0  ;;  %p4450_p13 = scmp.ne.s32.totalorder %s5458_s17, %s4449_s3  ;;  %s4588_s6 = smov [#allocation14]  }
 0x245   : > { %2243 = vst [vmem:[%s5236_s14 + $0x10] sm:$0xff] %v3745_v27  ;;  %3056 = vst [vmem:[%s5240_s21 + $0x10] sm:$0xff] %v3777_v28  ;;  %v3746_v31 = vpack.c.bf16 %v1907_v29, %v1905_v23  ;;  %v3778_v32 = vpack.c.bf16 %v2720_v30, %v2718_v24  ;;  %v1913_v41 = vadd.f32 %v1912_v39, %v5206_v48  ;;  %v1914_v43 = vpop.f32.mrb[42].mxu1  ;;  %v2727_v44 = vpop.f32.mrb[42].mxu0  ;;  %s4453_s15 = sshll.u32 %s4588_s6, 4  ;;  %s4454_s15 = int_to_ptr.vmem [resolvable:$false] %s4453_s15 }
 0x246   : > { %v2726_v42 = vadd.f32 %v2725_v40, %v5209_v49  ;;  %v1915_v45 = vadd.f32 %v1914_v43, %v5196_v35  ;;  %v2728_v46 = vadd.f32 %v2727_v44, %v5199_v36  ;;  %v1916_v47 = vpop.f32.mrb[43].mxu1  ;;  %v2729_v2 = vpop.f32.mrb[43].mxu0  ;;  %p4451_p5 = pnand %p4450_p13, %p5636_p10  ;;  %s4455_s24 = scalar_lea.vmem %s4454_s15, 8192 }
 0x247   : > { %2244 = vst [vmem:[%s5236_s14 + $0x18] sm:$0xff] %v3746_v31  ;;  %3057 = vst [vmem:[%s5240_s21 + $0x18] sm:$0xff] %v3778_v32  ;;  %v3747_v5 = vpack.c.bf16 %v1913_v41, %v1911_v37  ;;  %v1917_v51 = vadd.f32 %v1916_v47, %v5206_v48  ;;  %v2730_v52 = vadd.f32 %v2729_v2, %v5209_v49  ;;  %v1920_v55 = vpop.f32.mrb[44].mxu1  ;;  %v2733_v6 = vpop.f32.mrb[44].mxu0  ;;  %p4456_p6 = scmp.lt.s32.totalorder %s5458_s17, %s4454_s15  ;;  %p4457_p7 = scmp.lt.s32.totalorder %s4455_s24, %s4449_s3 }
 0x248   : > { %v3779_v50 = vpack.c.bf16 %v2726_v42, %v2724_v38  ;;  %v1921_v56 = vadd.f32 %v1920_v55, %v5196_v35  ;;  %v2734_v4 = vadd.f32 %v2733_v6, %v5199_v36  ;;  %v1922_v57 = vpop.f32.mrb[45].mxu1  ;;  %v2735_v58 = vpop.f32.mrb[45].mxu0  ;;  %s5456_s26 = scalar_lea.hbm %s5637_s16, %s5214_s9  ;;  %s5464_s13 = scalar_lea.hbm %s5638_s12, %s5214_s9 }
 0x249   : > { %2245 = vst [vmem:[%s5236_s14 + $0x20] sm:$0xff] %v3747_v5  ;;  %v3748_v53 = vpack.c.bf16 %v1917_v51, %v1915_v45  ;;  %v3780_v54 = vpack.c.bf16 %v2730_v52, %v2728_v46  ;;  %v1923_v59 = vadd.f32 %v1922_v57, %v5206_v48  ;;  %v2736_v60 = vadd.f32 %v2735_v58, %v5209_v49  ;;  %v1924_v61 = vpop.f32.mrb[46].mxu1  ;;  %v2737_v62 = vpop.f32.mrb[46].mxu0  ;;  %p4452_p3 = pneg %p4451_p5  ;;  %p4458_p9 = por %p4457_p7, %p4456_p6 }
 0x24a   : > { %3058 = vst [vmem:[%s5240_s21 + $0x20] sm:$0xff] %v3779_v50  ;;  %v1925_v63 = vadd.f32 %v1924_v61, %v5196_v35  ;;  %v2738_v0 = vadd.f32 %v2737_v62, %v5199_v36  ;;  %v1926_v1 = vpop.f32.mrb[47].mxu1  ;;  %v2739_v3 = vpop.f32.mrb[47].mxu0 }
 0x24b   : > { %2246 = vst [vmem:[%s5236_s14 + $0x28] sm:$0xff] %v3748_v53  ;;  %3059 = vst [vmem:[%s5240_s21 + $0x28] sm:$0xff] %v3780_v54  ;;  %v3749_v7 = vpack.c.bf16 %v1923_v59, %v1921_v56  ;;  %v3781_v8 = vpack.c.bf16 %v2736_v60, %v2734_v4  ;;  %v1927_v9 = vadd.f32 %v1926_v1, %v5206_v48  ;;  %v1930_v13 = vpop.f32.mrb[48].mxu1  ;;  %v2743_v14 = vpop.f32.mrb[48].mxu0  ;;  %p4459_p8 = pnand %p4458_p9, %p4452_p3 }
 0x24c   : > { %v2740_v10 = vadd.f32 %v2739_v3, %v5209_v49  ;;  %v1931_v15 = vadd.f32 %v1930_v13, %v5196_v35  ;;  %v2744_v16 = vadd.f32 %v2743_v14, %v5199_v36  ;;  %v1932_v17 = vpop.f32.mrb[49].mxu1  ;;  %v2745_v18 = vpop.f32.mrb[49].mxu0 }
 0x24d   : > { %2247 = vst [vmem:[%s5236_s14 + $0x30] sm:$0xff] %v3749_v7  ;;  %3060 = vst [vmem:[%s5240_s21 + $0x30] sm:$0xff] %v3781_v8  ;;  %v3750_v11 = vpack.c.bf16 %v1927_v9, %v1925_v63  ;;  %v1933_v19 = vadd.f32 %v1932_v17, %v5206_v48  ;;  %v2746_v20 = vadd.f32 %v2745_v18, %v5209_v49  ;;  %v1934_v21 = vpop.f32.mrb[50].mxu1  ;;  %v2747_v22 = vpop.f32.mrb[50].mxu0 }
 0x24e   : > { %v3782_v12 = vpack.c.bf16 %v2740_v10, %v2738_v0  ;;  %v1935_v23 = vadd.f32 %v1934_v21, %v5196_v35  ;;  %v2748_v24 = vadd.f32 %v2747_v22, %v5199_v36  ;;  %v1936_v25 = vpop.f32.mrb[51].mxu1  ;;  %v2749_v26 = vpop.f32.mrb[51].mxu0 }
 0x24f   : > { %2248 = vst [vmem:[%s5236_s14 + $0x38] sm:$0xff] %v3750_v11  ;;  %v3751_v27 = vpack.c.bf16 %v1933_v19, %v1931_v15  ;;  %v3783_v28 = vpack.c.bf16 %v2746_v20, %v2744_v16  ;;  %v1937_v29 = vadd.f32 %v1936_v25, %v5206_v48  ;;  %v2750_v30 = vadd.f32 %v2749_v26, %v5209_v49 }
 0x250   : > { %3061 = vst [vmem:[%s5240_s21 + $0x38] sm:$0xff] %v3782_v12 }
 0x251   : > { %2249 = vst [vmem:[%s5236_s14 + $0x40] sm:$0xff] %v3751_v27  ;;  %3062 = vst [vmem:[%s5240_s21 + $0x40] sm:$0xff] %v3783_v28  ;;  %v3752_v31 = vpack.c.bf16 %v1937_v29, %v1935_v23  ;;  %v3784_v32 = vpack.c.bf16 %v2750_v30, %v2748_v24  ;;  %v1940_v33 = vpop.f32.mrb[52].mxu1  ;;  %v2753_v34 = vpop.f32.mrb[52].mxu0 }
 0x252   : > { %v1941_v37 = vadd.f32 %v1940_v33, %v5196_v35  ;;  %v2754_v38 = vadd.f32 %v2753_v34, %v5199_v36  ;;  %v1942_v39 = vpop.f32.mrb[53].mxu1  ;;  %v2755_v40 = vpop.f32.mrb[53].mxu0 }
 0x253   : > { %2250 = vst [vmem:[%s5236_s14 + $0x48] sm:$0xff] %v3752_v31  ;;  %3063 = vst [vmem:[%s5240_s21 + $0x48] sm:$0xff] %v3784_v32  ;;  %v1943_v41 = vadd.f32 %v1942_v39, %v5206_v48  ;;  %v2756_v42 = vadd.f32 %v2755_v40, %v5209_v49  ;;  %v1944_v43 = vpop.f32.mrb[54].mxu1  ;;  %v2757_v44 = vpop.f32.mrb[54].mxu0 }
 0x254   : > { %v1945_v45 = vadd.f32 %v1944_v43, %v5196_v35  ;;  %v2758_v46 = vadd.f32 %v2757_v44, %v5199_v36  ;;  %v1946_v47 = vpop.f32.mrb[55].mxu1  ;;  %v2759_v2 = vpop.f32.mrb[55].mxu0 }
 0x255   : > { %v3753_v5 = vpack.c.bf16 %v1943_v41, %v1941_v37  ;;  %v3785_v50 = vpack.c.bf16 %v2756_v42, %v2754_v38  ;;  %v1947_v51 = vadd.f32 %v1946_v47, %v5206_v48  ;;  %v2760_v52 = vadd.f32 %v2759_v2, %v5209_v49 }
 0x257   : > { %2251 = vst [vmem:[%s5236_s14 + $0x50] sm:$0xff] %v3753_v5  ;;  %3064 = vst [vmem:[%s5240_s21 + $0x50] sm:$0xff] %v3785_v50  ;;  %v3754_v53 = vpack.c.bf16 %v1947_v51, %v1945_v45  ;;  %v3786_v54 = vpack.c.bf16 %v2760_v52, %v2758_v46 }
 0x259   : > { %2252 = vst [vmem:[%s5236_s14 + $0x58] sm:$0xff] %v3754_v53  ;;  %3065 = vst [vmem:[%s5240_s21 + $0x58] sm:$0xff] %v3786_v54  ;;  %v1950_v55 = vpop.f32.mrb[56].mxu1  ;;  %v2763_v6 = vpop.f32.mrb[56].mxu0 }
 0x25a   : > { %v1951_v56 = vadd.f32 %v1950_v55, %v5196_v35  ;;  %v2764_v4 = vadd.f32 %v2763_v6, %v5199_v36  ;;  %v1952_v57 = vpop.f32.mrb[57].mxu1  ;;  %v2765_v58 = vpop.f32.mrb[57].mxu0 }
 0x25b   : > { %v1953_v59 = vadd.f32 %v1952_v57, %v5206_v48  ;;  %v2766_v60 = vadd.f32 %v2765_v58, %v5209_v49  ;;  %v1954_v61 = vpop.f32.mrb[58].mxu1  ;;  %v2767_v62 = vpop.f32.mrb[58].mxu0 }
 0x25c   : > { %v1955_v63 = vadd.f32 %v1954_v61, %v5196_v35  ;;  %v2768_v0 = vadd.f32 %v2767_v62, %v5199_v36  ;;  %v1956_v1 = vpop.f32.mrb[59].mxu1  ;;  %v2769_v3 = vpop.f32.mrb[59].mxu0 }
 0x25d   : > { %v3755_v7 = vpack.c.bf16 %v1953_v59, %v1951_v56  ;;  %v3787_v8 = vpack.c.bf16 %v2766_v60, %v2764_v4  ;;  %v1957_v9 = vadd.f32 %v1956_v1, %v5206_v48  ;;  %v2770_v10 = vadd.f32 %v2769_v3, %v5209_v49 }
 0x25f   : > { %2253 = vst [vmem:[%s5236_s14 + $0x60] sm:$0xff] %v3755_v7  ;;  %3066 = vst [vmem:[%s5240_s21 + $0x60] sm:$0xff] %v3787_v8  ;;  %v3756_v11 = vpack.c.bf16 %v1957_v9, %v1955_v63  ;;  %v3788_v12 = vpack.c.bf16 %v2770_v10, %v2768_v0 }
 0x261   : > { %2254 = vst [vmem:[%s5236_s14 + $0x68] sm:$0xff] %v3756_v11  ;;  %3067 = vst [vmem:[%s5240_s21 + $0x68] sm:$0xff] %v3788_v12  ;;  %v1960_v13 = vpop.f32.mrb[60].mxu1  ;;  %v2773_v14 = vpop.f32.mrb[60].mxu0 }
 0x262   : > { %v1961_v15 = vadd.f32 %v1960_v13, %v5196_v35  ;;  %v2774_v16 = vadd.f32 %v2773_v14, %v5199_v36  ;;  %v1962_v17 = vpop.f32.mrb[61].mxu1  ;;  %v2775_v18 = vpop.f32.mrb[61].mxu0 }
 0x263   : > { %v1963_v19 = vadd.f32 %v1962_v17, %v5206_v48  ;;  %v2776_v20 = vadd.f32 %v2775_v18, %v5209_v49  ;;  %v1964_v21 = vpop.f32.mrb[62].mxu1  ;;  %v2777_v22 = vpop.f32.mrb[62].mxu0 }
 0x264   : > { %v1965_v23 = vadd.f32 %v1964_v21, %v5196_v35  ;;  %v2778_v24 = vadd.f32 %v2777_v22, %v5199_v36  ;;  %v1966_v25 = vpop.f32.mrb[63].mxu1  ;;  %v2779_v26 = vpop.f32.mrb[63].mxu0 }
 0x265   : > { %v3757_v27 = vpack.c.bf16 %v1963_v19, %v1961_v15  ;;  %v3789_v28 = vpack.c.bf16 %v2776_v20, %v2774_v16  ;;  %v1967_v29 = vadd.f32 %v1966_v25, %v5206_v48  ;;  %v2780_v30 = vadd.f32 %v2779_v26, %v5209_v49 }
 0x267   : > { %2255 = vst [vmem:[%s5236_s14 + $0x70] sm:$0xff] %v3757_v27  ;;  %3068 = vst [vmem:[%s5240_s21 + $0x70] sm:$0xff] %v3789_v28  ;;  %v3758_v31 = vpack.c.bf16 %v1967_v29, %v1965_v23  ;;  %v3790_v32 = vpack.c.bf16 %v2780_v30, %v2778_v24 }
 0x269   : > { %2256 = vst [vmem:[%s5236_s14 + $0x78] sm:$0xff] %v3758_v31  ;;  %3069 = vst [vmem:[%s5240_s21 + $0x78] sm:$0xff] %v3790_v32  ;;  %v1970_v33 = vpop.f32.mrb[64].mxu1  ;;  %v2783_v34 = vpop.f32.mrb[64].mxu0 }
 0x26a   : > { %v1971_v37 = vadd.f32 %v1970_v33, %v5196_v35  ;;  %v2784_v38 = vadd.f32 %v2783_v34, %v5199_v36  ;;  %v1972_v39 = vpop.f32.mrb[65].mxu1  ;;  %v2785_v40 = vpop.f32.mrb[65].mxu0 }
 0x26b   : > { %v1973_v41 = vadd.f32 %v1972_v39, %v5206_v48  ;;  %v2786_v42 = vadd.f32 %v2785_v40, %v5209_v49  ;;  %v1974_v43 = vpop.f32.mrb[66].mxu1  ;;  %v2787_v44 = vpop.f32.mrb[66].mxu0 }
 0x26c   : > { %v1975_v45 = vadd.f32 %v1974_v43, %v5196_v35  ;;  %v2788_v46 = vadd.f32 %v2787_v44, %v5199_v36  ;;  %v1976_v47 = vpop.f32.mrb[67].mxu1  ;;  %v2789_v2 = vpop.f32.mrb[67].mxu0 }
 0x26d   : > { %v3759_v5 = vpack.c.bf16 %v1973_v41, %v1971_v37  ;;  %v3791_v50 = vpack.c.bf16 %v2786_v42, %v2784_v38  ;;  %v1977_v51 = vadd.f32 %v1976_v47, %v5206_v48  ;;  %v2790_v52 = vadd.f32 %v2789_v2, %v5209_v49 }
 0x26f   : > { %2257 = vst [vmem:[%s5236_s14 + $0x80] sm:$0xff] %v3759_v5  ;;  %3070 = vst [vmem:[%s5240_s21 + $0x80] sm:$0xff] %v3791_v50  ;;  %v3760_v53 = vpack.c.bf16 %v1977_v51, %v1975_v45  ;;  %v3792_v54 = vpack.c.bf16 %v2790_v52, %v2788_v46 }
 0x271   : > { %2258 = vst [vmem:[%s5236_s14 + $0x88] sm:$0xff] %v3760_v53  ;;  %3071 = vst [vmem:[%s5240_s21 + $0x88] sm:$0xff] %v3792_v54  ;;  %v1980_v55 = vpop.f32.mrb[68].mxu1  ;;  %v2793_v6 = vpop.f32.mrb[68].mxu0 }
 0x272   : > { %v1981_v56 = vadd.f32 %v1980_v55, %v5196_v35  ;;  %v2794_v4 = vadd.f32 %v2793_v6, %v5199_v36  ;;  %v1982_v57 = vpop.f32.mrb[69].mxu1  ;;  %v2795_v58 = vpop.f32.mrb[69].mxu0 }
 0x273   : > { %v1983_v59 = vadd.f32 %v1982_v57, %v5206_v48  ;;  %v2796_v60 = vadd.f32 %v2795_v58, %v5209_v49  ;;  %v1984_v61 = vpop.f32.mrb[70].mxu1  ;;  %v2797_v62 = vpop.f32.mrb[70].mxu0 }
 0x274   : > { %v1985_v63 = vadd.f32 %v1984_v61, %v5196_v35  ;;  %v2798_v0 = vadd.f32 %v2797_v62, %v5199_v36  ;;  %v1986_v1 = vpop.f32.mrb[71].mxu1  ;;  %v2799_v3 = vpop.f32.mrb[71].mxu0 }
 0x275   : > { %v3761_v7 = vpack.c.bf16 %v1983_v59, %v1981_v56  ;;  %v3793_v8 = vpack.c.bf16 %v2796_v60, %v2794_v4  ;;  %v1987_v9 = vadd.f32 %v1986_v1, %v5206_v48  ;;  %v2800_v10 = vadd.f32 %v2799_v3, %v5209_v49 }
 0x277   : > { %2259 = vst [vmem:[%s5236_s14 + $0x90] sm:$0xff] %v3761_v7  ;;  %3072 = vst [vmem:[%s5240_s21 + $0x90] sm:$0xff] %v3793_v8  ;;  %v3762_v11 = vpack.c.bf16 %v1987_v9, %v1985_v63  ;;  %v3794_v12 = vpack.c.bf16 %v2800_v10, %v2798_v0 }
 0x279   : > { %2260 = vst [vmem:[%s5236_s14 + $0x98] sm:$0xff] %v3762_v11  ;;  %3073 = vst [vmem:[%s5240_s21 + $0x98] sm:$0xff] %v3794_v12  ;;  %v1990_v13 = vpop.f32.mrb[72].mxu1  ;;  %v2803_v14 = vpop.f32.mrb[72].mxu0 }
 0x27a   : > { %v1991_v15 = vadd.f32 %v1990_v13, %v5196_v35  ;;  %v2804_v16 = vadd.f32 %v2803_v14, %v5199_v36  ;;  %v1992_v17 = vpop.f32.mrb[73].mxu1  ;;  %v2805_v18 = vpop.f32.mrb[73].mxu0 }
 0x27b   : > { %v1993_v19 = vadd.f32 %v1992_v17, %v5206_v48  ;;  %v2806_v20 = vadd.f32 %v2805_v18, %v5209_v49  ;;  %v1994_v21 = vpop.f32.mrb[74].mxu1  ;;  %v2807_v22 = vpop.f32.mrb[74].mxu0 }
 0x27c   : > { %v1995_v23 = vadd.f32 %v1994_v21, %v5196_v35  ;;  %v2808_v24 = vadd.f32 %v2807_v22, %v5199_v36  ;;  %v1996_v25 = vpop.f32.mrb[75].mxu1  ;;  %v2809_v26 = vpop.f32.mrb[75].mxu0 }
 0x27d   : > { %v3763_v27 = vpack.c.bf16 %v1993_v19, %v1991_v15  ;;  %v3795_v28 = vpack.c.bf16 %v2806_v20, %v2804_v16  ;;  %v1997_v29 = vadd.f32 %v1996_v25, %v5206_v48  ;;  %v2810_v30 = vadd.f32 %v2809_v26, %v5209_v49 }
 0x27f   : > { %2261 = vst [vmem:[%s5236_s14 + $0xa0] sm:$0xff] %v3763_v27  ;;  %3074 = vst [vmem:[%s5240_s21 + $0xa0] sm:$0xff] %v3795_v28  ;;  %v3764_v31 = vpack.c.bf16 %v1997_v29, %v1995_v23  ;;  %v3796_v32 = vpack.c.bf16 %v2810_v30, %v2808_v24 }
 0x281   : > { %2262 = vst [vmem:[%s5236_s14 + $0xa8] sm:$0xff] %v3764_v31  ;;  %3075 = vst [vmem:[%s5240_s21 + $0xa8] sm:$0xff] %v3796_v32  ;;  %v2000_v33 = vpop.f32.mrb[76].mxu1  ;;  %v2813_v34 = vpop.f32.mrb[76].mxu0 }
 0x282   : > { %v2001_v37 = vadd.f32 %v2000_v33, %v5196_v35  ;;  %v2814_v38 = vadd.f32 %v2813_v34, %v5199_v36  ;;  %v2002_v39 = vpop.f32.mrb[77].mxu1  ;;  %v2815_v40 = vpop.f32.mrb[77].mxu0 }
 0x283   : > { %v2003_v41 = vadd.f32 %v2002_v39, %v5206_v48  ;;  %v2816_v42 = vadd.f32 %v2815_v40, %v5209_v49  ;;  %v2004_v43 = vpop.f32.mrb[78].mxu1  ;;  %v2817_v44 = vpop.f32.mrb[78].mxu0 }
 0x284   : > { %v2005_v45 = vadd.f32 %v2004_v43, %v5196_v35  ;;  %v2818_v46 = vadd.f32 %v2817_v44, %v5199_v36  ;;  %v2006_v47 = vpop.f32.mrb[79].mxu1  ;;  %v2819_v2 = vpop.f32.mrb[79].mxu0 }
 0x285   : > { %v3765_v5 = vpack.c.bf16 %v2003_v41, %v2001_v37  ;;  %v3797_v50 = vpack.c.bf16 %v2816_v42, %v2814_v38  ;;  %v2007_v51 = vadd.f32 %v2006_v47, %v5206_v48  ;;  %v2820_v52 = vadd.f32 %v2819_v2, %v5209_v49 }
 0x287   : > { %2263 = vst [vmem:[%s5236_s14 + $0xb0] sm:$0xff] %v3765_v5  ;;  %3076 = vst [vmem:[%s5240_s21 + $0xb0] sm:$0xff] %v3797_v50  ;;  %v3766_v53 = vpack.c.bf16 %v2007_v51, %v2005_v45  ;;  %v3798_v54 = vpack.c.bf16 %v2820_v52, %v2818_v46 }
 0x289   : > { %2264 = vst [vmem:[%s5236_s14 + $0xb8] sm:$0xff] %v3766_v53  ;;  %3077 = vst [vmem:[%s5240_s21 + $0xb8] sm:$0xff] %v3798_v54  ;;  %v2010_v55 = vpop.f32.mrb[80].mxu1  ;;  %v2823_v6 = vpop.f32.mrb[80].mxu0 }
 0x28a   : > { %v2011_v56 = vadd.f32 %v2010_v55, %v5196_v35  ;;  %v2824_v4 = vadd.f32 %v2823_v6, %v5199_v36  ;;  %v2012_v57 = vpop.f32.mrb[81].mxu1  ;;  %v2825_v58 = vpop.f32.mrb[81].mxu0 }
 0x28b   : > { %v2013_v59 = vadd.f32 %v2012_v57, %v5206_v48  ;;  %v2826_v60 = vadd.f32 %v2825_v58, %v5209_v49  ;;  %v2014_v61 = vpop.f32.mrb[82].mxu1  ;;  %v2827_v62 = vpop.f32.mrb[82].mxu0 }
 0x28c   : > { %v2015_v63 = vadd.f32 %v2014_v61, %v5196_v35  ;;  %v2828_v0 = vadd.f32 %v2827_v62, %v5199_v36  ;;  %v2016_v1 = vpop.f32.mrb[83].mxu1  ;;  %v2829_v3 = vpop.f32.mrb[83].mxu0 }
 0x28d   : > { %v3767_v7 = vpack.c.bf16 %v2013_v59, %v2011_v56  ;;  %v3799_v8 = vpack.c.bf16 %v2826_v60, %v2824_v4  ;;  %v2017_v9 = vadd.f32 %v2016_v1, %v5206_v48  ;;  %v2830_v10 = vadd.f32 %v2829_v3, %v5209_v49 }
 0x28f   : > { %2265 = vst [vmem:[%s5236_s14 + $0xc0] sm:$0xff] %v3767_v7  ;;  %3078 = vst [vmem:[%s5240_s21 + $0xc0] sm:$0xff] %v3799_v8  ;;  %v3768_v11 = vpack.c.bf16 %v2017_v9, %v2015_v63  ;;  %v3800_v12 = vpack.c.bf16 %v2830_v10, %v2828_v0 }
 0x291   : > { %2266 = vst [vmem:[%s5236_s14 + $0xc8] sm:$0xff] %v3768_v11  ;;  %3079 = vst [vmem:[%s5240_s21 + $0xc8] sm:$0xff] %v3800_v12  ;;  %v2020_v13 = vpop.f32.mrb[84].mxu1  ;;  %v2833_v14 = vpop.f32.mrb[84].mxu0 }
 0x292   : > { %v2021_v15 = vadd.f32 %v2020_v13, %v5196_v35  ;;  %v2834_v16 = vadd.f32 %v2833_v14, %v5199_v36  ;;  %v2022_v17 = vpop.f32.mrb[85].mxu1  ;;  %v2835_v18 = vpop.f32.mrb[85].mxu0 }
 0x293   : > { %v2023_v19 = vadd.f32 %v2022_v17, %v5206_v48  ;;  %v2836_v20 = vadd.f32 %v2835_v18, %v5209_v49  ;;  %v2024_v21 = vpop.f32.mrb[86].mxu1  ;;  %v2837_v22 = vpop.f32.mrb[86].mxu0 }
 0x294   : > { %v2025_v23 = vadd.f32 %v2024_v21, %v5196_v35  ;;  %v2838_v24 = vadd.f32 %v2837_v22, %v5199_v36  ;;  %v2026_v25 = vpop.f32.mrb[87].mxu1  ;;  %v2839_v26 = vpop.f32.mrb[87].mxu0 }
 0x295   : > { %v3769_v27 = vpack.c.bf16 %v2023_v19, %v2021_v15  ;;  %v3801_v28 = vpack.c.bf16 %v2836_v20, %v2834_v16  ;;  %v2027_v29 = vadd.f32 %v2026_v25, %v5206_v48  ;;  %v2840_v30 = vadd.f32 %v2839_v26, %v5209_v49 }
 0x297   : > { %2267 = vst [vmem:[%s5236_s14 + $0xd0] sm:$0xff] %v3769_v27  ;;  %3080 = vst [vmem:[%s5240_s21 + $0xd0] sm:$0xff] %v3801_v28  ;;  %v3770_v31 = vpack.c.bf16 %v2027_v29, %v2025_v23  ;;  %v3802_v32 = vpack.c.bf16 %v2840_v30, %v2838_v24 }
 0x299   : > { %2268 = vst [vmem:[%s5236_s14 + $0xd8] sm:$0xff] %v3770_v31  ;;  %3081 = vst [vmem:[%s5240_s21 + $0xd8] sm:$0xff] %v3802_v32  ;;  %v2030_v33 = vpop.f32.mrb[88].mxu1  ;;  %v2843_v34 = vpop.f32.mrb[88].mxu0 }
 0x29a   : > { %v2031_v37 = vadd.f32 %v2030_v33, %v5196_v35  ;;  %v2844_v38 = vadd.f32 %v2843_v34, %v5199_v36  ;;  %v2032_v39 = vpop.f32.mrb[89].mxu1  ;;  %v2845_v40 = vpop.f32.mrb[89].mxu0 }
 0x29b   : > { %v2033_v41 = vadd.f32 %v2032_v39, %v5206_v48  ;;  %v2846_v42 = vadd.f32 %v2845_v40, %v5209_v49  ;;  %v2034_v43 = vpop.f32.mrb[90].mxu1  ;;  %v2847_v44 = vpop.f32.mrb[90].mxu0 }
 0x29c   : > { %v2035_v45 = vadd.f32 %v2034_v43, %v5196_v35  ;;  %v2848_v46 = vadd.f32 %v2847_v44, %v5199_v36  ;;  %v2036_v47 = vpop.f32.mrb[91].mxu1  ;;  %v2849_v2 = vpop.f32.mrb[91].mxu0 }
 0x29d   : > { %v3771_v5 = vpack.c.bf16 %v2033_v41, %v2031_v37  ;;  %v3803_v50 = vpack.c.bf16 %v2846_v42, %v2844_v38  ;;  %v2037_v51 = vadd.f32 %v2036_v47, %v5206_v48  ;;  %v2850_v52 = vadd.f32 %v2849_v2, %v5209_v49 }
 0x29f   : > { %2269 = vst [vmem:[%s5236_s14 + $0xe0] sm:$0xff] %v3771_v5  ;;  %3082 = vst [vmem:[%s5240_s21 + $0xe0] sm:$0xff] %v3803_v50  ;;  %v3772_v53 = vpack.c.bf16 %v2037_v51, %v2035_v45  ;;  %v3804_v54 = vpack.c.bf16 %v2850_v52, %v2848_v46 }
 0x2a1   : > { %2270 = vst [vmem:[%s5236_s14 + $0xe8] sm:$0xff] %v3772_v53  ;;  %3083 = vst [vmem:[%s5240_s21 + $0xe8] sm:$0xff] %v3804_v54  ;;  %v2040_v55 = vpop.f32.mrb[92].mxu1  ;;  %v2853_v6 = vpop.f32.mrb[92].mxu0 }
 0x2a2   : > { %v2041_v56 = vadd.f32 %v2040_v55, %v5196_v35  ;;  %v2854_v4 = vadd.f32 %v2853_v6, %v5199_v36  ;;  %v2042_v57 = vpop.f32.mrb[93].mxu1  ;;  %v2855_v58 = vpop.f32.mrb[93].mxu0 }
 0x2a3   : > { %v2043_v59 = vadd.f32 %v2042_v57, %v5206_v48  ;;  %v2856_v60 = vadd.f32 %v2855_v58, %v5209_v49  ;;  %v2044_v61 = vpop.f32.mrb[94].mxu1  ;;  %v2857_v62 = vpop.f32.mrb[94].mxu0 }
 0x2a4   : > { %v2045_v63 = vadd.f32 %v2044_v61, %v5196_v35  ;;  %v2858_v0 = vadd.f32 %v2857_v62, %v5199_v36  ;;  %v2046_v1 = vpop.f32.mrb[95].mxu1  ;;  %v2859_v3 = vpop.f32.mrb[95].mxu0 }
 0x2a5   : > { %v3773_v7 = vpack.c.bf16 %v2043_v59, %v2041_v56  ;;  %v3805_v8 = vpack.c.bf16 %v2856_v60, %v2854_v4  ;;  %v2047_v9 = vadd.f32 %v2046_v1, %v5206_v48  ;;  %v2860_v10 = vadd.f32 %v2859_v3, %v5209_v49 }
 0x2a7   : > { %2271 = vst [vmem:[%s5236_s14 + $0xf0] sm:$0xff] %v3773_v7  ;;  %3084 = vst [vmem:[%s5240_s21 + $0xf0] sm:$0xff] %v3805_v8  ;;  %v3774_v35 = vpack.c.bf16 %v2047_v9, %v2045_v63  ;;  %v3806_v11 = vpack.c.bf16 %v2860_v10, %v2858_v0 }
 0x2a9   : > { %2272 = vst [vmem:[%s5236_s14 + $0xf8] sm:$0xff] %v3774_v35  ;;  %3085 = vst [vmem:[%s5240_s21 + $0xf8] sm:$0xff] %v3806_v11 }
 0x2aa   : > { %4462 = shalt.err (!%p4459_p8)
}
 0x2ab   : > { %s4463_s23 = scalar_lea.hbm %s5456_s26, 4096  ;;  %s4467_s14 = scalar_lea.hbm %s5637_s16, 8192 }
 0x2ac   : > { %p4464_p4 = scmp.ne.s32.totalorder %s5456_s26, %s4463_s23  ;;  %p4468_p11 = scmp.lt.u32.totalorder %s5456_s26, %s5637_s16 }
 0x2ad   : > { %p4469_p1 = scmp.lt.u32.totalorder %s4467_s14, %s4463_s23  ;;  %p4471_p13 = scmp.lt.u32.totalorder %s4463_s23, %s5456_s26 }
 0x2ae   : > { %p4465_p12 = pnand %p4464_p4, %p5636_p10 }
 0x2af   : > { %p4470_p0 = por %p4469_p1, %p4468_p11 }
 0x2b0   : > { %p4466_p2 = pneg %p4465_p12 }
 0x2b1   : > { %p4472_p5 = por %p4471_p13, %p4470_p0 }
 0x2b3   : > { %p4473_p3 = pnand %p4472_p5, %p4466_p2 }
 0x2b5   : > { %4476 = shalt.err (!%p4473_p3)
}
 0x2b6   : > { %3861 = dma.vmem_to_hbm [thread:$0]  (%p5636_p10), %s5458_s17, 4096, %s5456_s26, %s5472_s27, %s4586_s8, %s4586_s8, %s4587_s11  }
 0x2b7   : > { %s4477_s28 = scalar_lea.vmem %s5466_s1, 4096  ;;  %s4589_s25 = smov [#allocation16]  }
 0x2b8   : > { %p4478_p6 = scmp.ne.s32.totalorder %s5466_s1, %s4477_s28  ;;  %s4481_s30 = sshll.u32 %s4589_s25, 4  ;;  %s4482_s30 = int_to_ptr.vmem [resolvable:$false] %s4481_s30 }
 0x2b9   : > { %s4483_s3 = scalar_lea.vmem %s4482_s30, 8192  ;;  %p4484_p8 = scmp.lt.s32.totalorder %s5466_s1, %s4482_s30 }
 0x2ba   : > { %p4479_p7 = pnand %p4478_p6, %p5636_p10  ;;  %p4485_p4 = scmp.lt.s32.totalorder %s4483_s3, %s4477_s28 }
 0x2bc   : > { %p4480_p9 = pneg %p4479_p7  ;;  %p4486_p12 = por %p4485_p4, %p4484_p8 }
 0x2be   : > { %p4487_p2 = pnand %p4486_p12, %p4480_p9 }
 0x2c0   : > { %4490 = shalt.err (!%p4487_p2)
}
 0x2c1   : > { %s4491_s17 = scalar_lea.hbm %s5464_s13, 4096  ;;  %s4495_s15 = scalar_lea.hbm %s5638_s12, 8192 }
 0x2c2   : > { %p4492_p11 = scmp.ne.s32.totalorder %s5464_s13, %s4491_s17  ;;  %p4496_p13 = scmp.lt.u32.totalorder %s5464_s13, %s5638_s12 }
 0x2c3   : > { %p4497_p5 = scmp.lt.u32.totalorder %s4495_s15, %s4491_s17  ;;  %p4499_p6 = scmp.lt.u32.totalorder %s4491_s17, %s5464_s13 }
 0x2c4   : > { %p4493_p1 = pnand %p4492_p11, %p5636_p10 }
 0x2c5   : > { %p4498_p3 = por %p4497_p5, %p4496_p13 }
 0x2c6   : > { %p4494_p0 = pneg %p4493_p1 }
 0x2c7   : > { %p4500_p7 = por %p4499_p6, %p4498_p3 }
 0x2c9   : > { %p4501_p9 = pnand %p4500_p7, %p4494_p0 }
 0x2cb   : > { %4504 = shalt.err (!%p4501_p9)
}
 0x2cc   : > { %3862 = dma.vmem_to_hbm [thread:$0]  (%p5636_p10), %s5466_s1, 4096, %s5464_s13, %s5472_s27, %s4586_s8, %s4586_s8, %s4587_s11  }
 0x2cd PF: > { %s5639_s29 = sld [smem:[#allocation23_spill]]  ;;  %s5640_s9 = sld [smem:[#allocation28_spill]] }
 0x2ce   : > { %s5641_s14 = sld [smem:[#allocation26_spill]] }
 0x2d3   : > { %s3166_s21 = sand.u32 1, %s5639_s29   ;;  %p5642_p8 = scmp.ne.s32.totalorder %s5640_s9, 0 }
 0x2d4   : > { %p5643_p4 = scmp.ge.s32.totalorder %s5641_s14, 2  ;;  %s3167_s22 = scalar_lea.sflag [#allocation4], %s3166_s21 }
 0x2d6   : > { %p3887_p12 = pnand %p5643_p4, %p5642_p8 }
 0x2d8   : > { %4546 = dma.done.wait (!%p3887_p12), %s3167_s22, 4096  }
 0x2d9   : > { %4548 = vsyncadd (!%p3887_p12), %s3167_s22, 4294963200  ;;  %s5644_s20 = sadd.s32 4294967294, %s5641_s14  }
 0x2da   : > { %s3175_s28 = sand.u32 1, %s5644_s20  }
 0x2db   : > { %s3176_s25 = scalar_lea.sflag [#allocation15], %s3175_s28 }
 0x2dc   : > { %4550 = dma.done.wait (!%p3887_p12), %s3176_s25, 8192  }
 0x2dd   : > { %4552 = vsyncadd (!%p3887_p12), %s3176_s25, 4294959104  ;;  %s36_s22 = sadd.s32 1, %s5641_s14   ;;  %s5645_s8 = sld [smem:[#allocation30_spill]] }
 0x2de   : > { %p33_p10 = scmp.ge.s32.totalorder %s36_s22, 4   ;;  %s5646_s20 = sld [smem:[#allocation25_spill]] }
 0x2df   : > { %s5647_s21 = sld [smem:[#allocation29_spill]]  ;;  %s5648_s17 = smov %s4559_s18 }
 0x2e0   : > { %s5649_s18 = smov %s4563_s19  ;;  %35 = sbr.rel (!%p33_p10) target bundleno = 20 (0x14), region = 169 }
 0x2e3   : > { %s5650_s19 = smov %s5645_s8 }
 0x2e7   :  { %3190 = vsyncpa [#allocation3], 1 }
 0x2e8   :  { %3192 = vsyncpa [#allocation3 + $0x1], 1 }
 0x2e9   :  { %3193 = vsyncpa [#allocation6], 1 }
 0x2ea   :  { %3195 = vsyncpa [#allocation6 + $0x1], 1 }
 0x2eb   :  { %3196 = vsyncpa [#allocation9], 1 }
 0x2ec   :  { %3197 = vsyncpa [#allocation12], 1 }
 0x2ed   :  { %3198 = vsyncpa [#allocation4], 1 }
 0x2ee   :  { %3200 = vsyncpa [#allocation4 + $0x1], 1 }
 0x2ef   :  { %3201 = vsyncpa [#allocation15], 1 }
 0x2f0   :  { %3203 = vsyncpa [#allocation15 + $0x1], 1 }

</bundles_post_ra>
